<compile_context>
chip_gen: v7x
topology: tpu7x:2x2x1
jax: 0.10.0
libtpu: 0.0.40
codegen_flags: <defaults>
</compile_context>

<pallas_src>
import functools

import jax
import jax.numpy as jnp
from jax.experimental import pallas as pl
from jax.experimental.pallas import tpu as pltpu

C_IN = 3      # VGG16 input channels
C_OUT = 64    # VGG16 first-block channels
K = 3         # 3x3 kernels
_TAIL = 8     # extra zero rows after the flat conv1-diff scratch: conv2 taps read up to
              # 2 rows past the tile, keep those reads in-bounds and deterministic.


def _fused_loss_kernel(px_ref, py_ref, w1_ref, b1_ref, w2_ref, mmid_ref, mout_ref,
                       out_ref, mid_ref, *, tile_h, wp):
    """One (batch, row-tile) step of the fused perceptual loss.

    px_ref, py_ref : ((tile_h+2)*wp, 27) bf16   im2col'ed conv1 patches (input / target)
    w1_ref         : (27, 64) bf16              conv1 weights, (ky,kx,cin)-flattened
    b1_ref         : (1, 64)  f32               conv1 bias
    w2_ref         : (9, 64, 64) bf16           conv2 weights, tap-major
    mmid_ref       : ((tile_h+2)*wp, 1) f32     1.0 on conv2 SAME-padding interior, else 0
    mout_ref       : (tile_h*wp, 1) f32         1.0 on valid output columns, else 0
    out_ref        : (1, 1) f32                 per-batch-element sum((fx-fy)^2) accumulator
    mid_ref        : ((tile_h+2)*wp + _TAIL, 64) bf16 scratch: relu(conv1 x) - relu(conv1 y)
    """
    t = pl.program_id(1)
    l_mid = (tile_h + 2) * wp
    l_out = tile_h * wp

    @pl.when(t == 0)
    def _():
        out_ref[...] = jnp.zeros_like(out_ref)

    # ---- conv1 + bias + ReLU for both images (one matmul each), then difference ----
    w1 = w1_ref[...]
    b1 = b1_ref[...]
    hx = jnp.maximum(jnp.dot(px_ref[...], w1, preferred_element_type=jnp.float32) + b1, 0.0)
    hy = jnp.maximum(jnp.dot(py_ref[...], w1, preferred_element_type=jnp.float32) + b1, 0.0)
    # Zero the SAME-padding border of the conv1 activation (mask precomputed on host),
    # store as bf16 (half the scratch VMEM + half the shifted-slice traffic for conv2).
    mid_ref[pl.ds(0, l_mid), :] = ((hx - hy) * mmid_ref[...]).astype(jnp.bfloat16)
    mid_ref[pl.ds(l_mid, _TAIL), :] = jnp.zeros((_TAIL, C_OUT), jnp.bfloat16)

    # ---- conv2 of the feature difference (the conv2 bias cancels in fx - fy) ----
    # Flat-offset taps: flat output row r (= y*wp + x) needs flat mid rows r + ky*wp + kx.
    # Computed at full padded width; the 2 wrap-around columns are masked out below.
    acc = jnp.zeros((l_out, C_OUT), jnp.float32)
    for ky in range(K):
        for kx in range(K):
            off = ky * wp + kx
            acc = acc + jnp.dot(mid_ref[pl.ds(off, l_out), :], w2_ref[ky * K + kx],
                                preferred_element_type=jnp.float32)
    # (K-grouping of taps into 128/256-wide contractions was considered; the in-kernel
    #  lane concatenation it requires costs comparable relayout to what it saves, so the
    #  taps are kept as 9 K=64 matmuls on shift-only LHS slices.)

    sq = acc * mout_ref[...]
    out_ref[...] = out_ref[...] + jnp.sum(sq * sq)


def _pick_tile_h(h, w, budget_bytes=24 << 20):
    """Largest row tile (divisor of h) whose per-step VMEM footprint fits the budget."""
    wp = w + 2
    best = 1
    for th in range(1, h + 1):
        if h % th:
            continue
        l_mid = (th + 2) * wp
        need = (
            2 * 2 * l_mid * 128 * 2        # x & y patch tiles, double-buffered, bf16 (lane-padded)
            + (l_mid + _TAIL) * 128 * 2    # bf16 diff scratch
            + 3 * th * wp * 128 * 4        # f32 conv2 accumulator + live temporaries
        )
        if need <= budget_bytes:
            best = th
    return best


def _im2col_tiles(img_nhwc, tile_h):
    """(N,H,W,3) -> (N, H//tile_h, (tile_h+2)*(W+2), 27) bf16 conv1 patches with 2-row halo."""
    n, h, w, _ = img_nhwc.shape
    hp, wp = h + 2, w + 2
    xp2 = jnp.pad(img_nhwc, ((0, 0), (2, 2), (2, 2), (0, 0)))
    taps = [xp2[:, ky:ky + hp, kx:kx + wp, :] for ky in range(K) for kx in range(K)]
    patches = jnp.concatenate(taps, axis=-1)                       # (N, Hp, Wp, 27)
    tiles = [patches[:, s:s + tile_h + 2] for s in range(0, h, tile_h)]
    out = jnp.stack(tiles, axis=1)                                 # (N, nt, TH+2, Wp, 27)
    return out.reshape(n, len(tiles), (tile_h + 2) * wp, K * K * C_IN).astype(jnp.bfloat16)


def perceptual_loss(x_nchw, y_nchw, w1, b1, w2, mean, std, *, tile_h=None):
    """mean((vgg3(norm(x)) - vgg3(norm(y)))**2), fused in one Pallas kernel.

    w1: (3,3,3,64) HWIO, b1: (64,), w2: (3,3,64,64) HWIO. The conv2 bias cancels in the
    feature difference and is not needed by the kernel.
    """
    n, c, h, w = x_nchw.shape
    assert c == C_IN and y_nchw.shape == x_nchw.shape
    wp = w + 2
    tile_h = tile_h or _pick_tile_h(h, w)
    assert h % tile_h == 0, (h, tile_h)
    nt = h // tile_h
    l_mid = (tile_h + 2) * wp
    l_out = tile_h * wp

    # --- host-side glue: normalize, NCHW->NHWC, im2col for conv1, masks, weight packing ---
    xn = jnp.transpose((x_nchw - mean) / std, (0, 2, 3, 1)).astype(jnp.float32)
    yn = jnp.transpose((y_nchw - mean) / std, (0, 2, 3, 1)).astype(jnp.float32)
    px = _im2col_tiles(xn, tile_h)
    py = _im2col_tiles(yn, tile_h)

    w1f = w1.reshape(K * K * C_IN, C_OUT).astype(jnp.bfloat16)
    w2f = w2.reshape(K * K, C_OUT, C_OUT).astype(jnp.bfloat16)
    b1f = b1.reshape(1, C_OUT).astype(jnp.float32)

    cols = jnp.arange(wp)
    col_interior = (cols > 0) & (cols < wp - 1)
    rows = jnp.arange(tile_h + 2)
    mmid = []
    for t in range(nt):
        grow = rows + t * tile_h                      # global padded-row index
        row_interior = (grow > 0) & (grow < h + 1)
        mmid.append((row_interior[:, None] & col_interior[None, :]).astype(jnp.float32))
    mmid = jnp.stack(mmid, 0).reshape(nt, l_mid, 1)   # conv2 zero-padding mask per tile
    mout = jnp.tile(cols < w, (tile_h,)).astype(jnp.float32).reshape(l_out, 1)

    kernel = functools.partial(_fused_loss_kernel, tile_h=tile_h, wp=wp)
    sums = pl.pallas_call(
        kernel,
        out_shape=jax.ShapeDtypeStruct((n, 1, 1), jnp.float32),
        grid_spec=pltpu.PrefetchScalarGridSpec(
            num_scalar_prefetch=0,
            grid=(n, nt),
            in_specs=[
                pl.BlockSpec((None, None, l_mid, K * K * C_IN), lambda b, t: (b, t, 0, 0)),
                pl.BlockSpec((None, None, l_mid, K * K * C_IN), lambda b, t: (b, t, 0, 0)),
                pl.BlockSpec((K * K * C_IN, C_OUT), lambda b, t: (0, 0)),
                pl.BlockSpec((1, C_OUT), lambda b, t: (0, 0)),
                pl.BlockSpec((K * K, C_OUT, C_OUT), lambda b, t: (0, 0, 0)),
                pl.BlockSpec((None, l_mid, 1), lambda b, t: (t, 0, 0)),
                pl.BlockSpec((l_out, 1), lambda b, t: (0, 0)),
            ],
            out_specs=pl.BlockSpec((None, 1, 1), lambda b, t: (b, 0, 0)),
            scratch_shapes=[pltpu.VMEM((l_mid + _TAIL, C_OUT), jnp.bfloat16)],
        ),
        compiler_params=pltpu.CompilerParams(
            dimension_semantics=("parallel", "arbitrary"),
            vmem_limit_bytes=48 * 1024 * 1024,  # tune together with tile_h per chip
        ),
    )(px, py, w1f, b1f, w2f, mmid, mout)
    return jnp.sum(sums) / (n * h * w * C_OUT)


class PerceptualLossPallas:
    """Pallas port of the PyTorch PerceptualLoss module."""

    def __init__(self, key):
        # TODO(synk): torch.hub pretrained VGG16 weights cannot be loaded in-script;
        # deterministic synthetic weights with identical shapes stand in.
        k1, k2, k3, k4 = jax.random.split(key, 4)
        self.w1 = 0.10 * jax.random.normal(k1, (K, K, C_IN, C_OUT), jnp.float32)
        self.b1 = 0.01 * jax.random.normal(k2, (C_OUT,), jnp.float32)
        self.w2 = 0.05 * jax.random.normal(k3, (K, K, C_OUT, C_OUT), jnp.float32)
        self.b2 = 0.01 * jax.random.normal(k4, (C_OUT,), jnp.float32)  # cancels in the loss
        self.mean = jnp.array([0.485, 0.456, 0.406], jnp.float32).reshape(1, 3, 1, 1)
        self.std = jnp.array([0.229, 0.224, 0.225], jnp.float32).reshape(1, 3, 1, 1)

    def __call__(self, input_img, target_img, *, tile_h=None):
        return perceptual_loss(input_img, target_img, self.w1, self.b1, self.w2,
                               self.mean, self.std, tile_h=tile_h)


def _ref_loss(x_nchw, y_nchw, w1, b1, w2, b2, mean, std):
    """Pure-JAX float32 reference (lax conv) for correctness checking."""
    def feats(img):
        xn = jnp.transpose((img - mean) / std, (0, 2, 3, 1)).astype(jnp.float32)
        dn = ("NHWC", "HWIO", "NHWC")
        h = jax.lax.conv_general_dilated(xn, w1, (1, 1), "SAME", dimension_numbers=dn,
                                         precision=jax.lax.Precision.HIGHEST) + b1
        h = jnp.maximum(h, 0.0)
        return jax.lax.conv_general_dilated(h, w2, (1, 1), "SAME", dimension_numbers=dn,
                                            precision=jax.lax.Precision.HIGHEST) + b2
    return jnp.mean((feats(x_nchw) - feats(y_nchw)) ** 2)


if __name__ == "__main__":
    key = jax.random.PRNGKey(0)
    k_in, k_tgt = jax.random.split(key)
    n, c, hh, ww = 2, 3, 16, 16
    input_img = jax.random.uniform(k_in, (n, c, hh, ww), jnp.float32)
    target_img = jax.random.uniform(k_tgt, (n, c, hh, ww), jnp.float32)

    loss_mod = PerceptualLossPallas(jax.random.PRNGKey(42))

    # tile_h=8 -> grid (N, 2): exercises the row-tiled / halo / accumulate path.
    loss = jax.block_until_ready(loss_mod(input_img, target_img, tile_h=8))

    loss_ref = jax.block_until_ready(
        _ref_loss(input_img, target_img, loss_mod.w1, loss_mod.b1,
                  loss_mod.w2, loss_mod.b2, loss_mod.mean, loss_mod.std))

    # bf16 MXU operands (f32 accumulate) vs a float32 reference: allow ~1-2% slack.
    assert jnp.allclose(loss, loss_ref, rtol=2e-2, atol=1e-5), (loss, loss_ref)

    # Auto-picked tile (single tile covers H=16) as an extra smoke test.
    loss2 = jax.block_until_ready(loss_mod(input_img, target_img))
    assert jnp.allclose(loss2, loss_ref, rtol=2e-2, atol=1e-5), (loss2, loss_ref)

    print("KERNEL_OK")
</pallas_src>

<mosaic_0001>
module attributes {stable_mosaic.version = 11 : i64} {
  func.func @_fused_loss_kernel(%arg0: i32, %arg1: i32, %arg2: memref<1x1x180x27xbf16, #tpu.memory_space<vmem>>, %arg3: memref<1x1x180x27xbf16, #tpu.memory_space<vmem>>, %arg4: memref<27x64xbf16, #tpu.memory_space<vmem>>, %arg5: memref<1x64xf32, #tpu.memory_space<vmem>>, %arg6: memref<9x64x64xbf16, #tpu.memory_space<vmem>>, %arg7: memref<1x180x1xf32, #tpu.memory_space<vmem>>, %arg8: memref<144x1xf32, #tpu.memory_space<vmem>>, %arg9: memref<1x1x1xf32, #tpu.memory_space<vmem>>, %arg10: memref<188x64xbf16, #tpu.memory_space<vmem>>) attributes {dimension_semantics = [#tpu.dimension_semantics<parallel>, #tpu.dimension_semantics<arbitrary>], iteration_bounds = array<i64: 2, 2>, scalar_prefetch = 0 : i64, scratch_operands = 1 : i64, tpu.core_type = #tpu.core_type<tc>, window_params = [{transform_indices = @transform_0, window_bounds = array<i64: 1, 1, 180, 27>}, {transform_indices = @transform_1, window_bounds = array<i64: 1, 1, 180, 27>}, {pipeline_mode = #tpu.pipeline_mode<synchronous>, transform_indices = @transform_2, window_bounds = array<i64: 27, 64>}, {pipeline_mode = #tpu.pipeline_mode<synchronous>, transform_indices = @transform_3, window_bounds = array<i64: 1, 64>}, {pipeline_mode = #tpu.pipeline_mode<synchronous>, transform_indices = @transform_4, window_bounds = array<i64: 9, 64, 64>}, {transform_indices = @transform_5, window_bounds = array<i64: 1, 180, 1>}, {pipeline_mode = #tpu.pipeline_mode<synchronous>, transform_indices = @transform_6, window_bounds = array<i64: 144, 1>}, {transform_indices = @transform_7, window_bounds = array<i64: 1, 1, 1>}]} {
    %c0_i32 = arith.constant 0 : i32
    %0 = arith.cmpi eq, %arg1, %c0_i32 : i32
    %1 = arith.extui %0 : i1 to i32
    %c0_i32_0 = arith.constant 0 : i32
    %2 = arith.cmpi ne, %1, %c0_i32_0 : i32
    scf.if %2 {
      %cst_72 = arith.constant 0.000000e+00 : f32
      %89 = vector.broadcast %cst_72 : f32 to vector<1x1xf32>
      %c0_73 = arith.constant 0 : index
      %c0_74 = arith.constant 0 : index
      %c0_75 = arith.constant 0 : index
      %90 = vector.load %arg9[%c0_73, %c0_74, %c0_75] : memref<1x1x1xf32, #tpu.memory_space<vmem>>, vector<1x1x1xf32>
      %91 = vector.shape_cast %90 : vector<1x1x1xf32> to vector<1x1xf32>
      %92 = vector.shape_cast %89 : vector<1x1xf32> to vector<1x1x1xf32>
      tpu.vector_store %arg9[%c0_73, %c0_74, %c0_75], %92 {strides = array<i32>} : memref<1x1x1xf32, #tpu.memory_space<vmem>>, vector<1x1x1xf32>,
    } else {
    }
    %c0 = arith.constant 0 : index
    %c0_1 = arith.constant 0 : index
    %3 = vector.load %arg4[%c0, %c0_1] : memref<27x64xbf16, #tpu.memory_space<vmem>>, vector<27x64xbf16>
    %c0_2 = arith.constant 0 : index
    %c0_3 = arith.constant 0 : index
    %4 = vector.load %arg5[%c0_2, %c0_3] : memref<1x64xf32, #tpu.memory_space<vmem>>, vector<1x64xf32>
    %c0_4 = arith.constant 0 : index
    %c0_5 = arith.constant 0 : index
    %c0_6 = arith.constant 0 : index
    %c0_7 = arith.constant 0 : index
    %5 = vector.load %arg2[%c0_4, %c0_5, %c0_6, %c0_7] : memref<1x1x180x27xbf16, #tpu.memory_space<vmem>>, vector<1x1x180x27xbf16>
    %6 = vector.shape_cast %5 : vector<1x1x180x27xbf16> to vector<180x27xbf16>
    %cst = arith.constant dense<0.000000e+00> : vector<180x64xf32>
    %7 = tpu.matmul %6, %3, %cst {dimension_numbers = #tpu.dot_dimension_numbers<[1], [0], [0], [1], [0, 0, 1, 1], [], []>} : vector<180x27xbf16>, vector<27x64xbf16>, vector<180x64xf32> -> vector<180x64xf32>
    %8 = vector.broadcast %4 : vector<1x64xf32> to vector<180x64xf32>
    %9 = arith.addf %7, %8 : vector<180x64xf32>
    %cst_8 = arith.constant 0.000000e+00 : f32
    %10 = vector.broadcast %cst_8 : f32 to vector<180x64xf32>
    %11 = arith.maximumf %9, %10 : vector<180x64xf32>
    %c0_9 = arith.constant 0 : index
    %c0_10 = arith.constant 0 : index
    %c0_11 = arith.constant 0 : index
    %c0_12 = arith.constant 0 : index
    %12 = vector.load %arg3[%c0_9, %c0_10, %c0_11, %c0_12] : memref<1x1x180x27xbf16, #tpu.memory_space<vmem>>, vector<1x1x180x27xbf16>
    %13 = vector.shape_cast %12 : vector<1x1x180x27xbf16> to vector<180x27xbf16>
    %cst_13 = arith.constant dense<0.000000e+00> : vector<180x64xf32>
    %14 = tpu.matmul %13, %3, %cst_13 {dimension_numbers = #tpu.dot_dimension_numbers<[1], [0], [0], [1], [0, 0, 1, 1], [], []>} : vector<180x27xbf16>, vector<27x64xbf16>, vector<180x64xf32> -> vector<180x64xf32>
    %15 = vector.broadcast %4 : vector<1x64xf32> to vector<180x64xf32>
    %16 = arith.addf %14, %15 : vector<180x64xf32>
    %cst_14 = arith.constant 0.000000e+00 : f32
    %17 = vector.broadcast %cst_14 : f32 to vector<180x64xf32>
    %18 = arith.maximumf %16, %17 : vector<180x64xf32>
    %19 = arith.subf %11, %18 : vector<180x64xf32>
    %c0_15 = arith.constant 0 : index
    %c0_16 = arith.constant 0 : index
    %c0_17 = arith.constant 0 : index
    %20 = vector.load %arg7[%c0_15, %c0_16, %c0_17] : memref<1x180x1xf32, #tpu.memory_space<vmem>>, vector<1x180x1xf32>
    %21 = vector.shape_cast %20 : vector<1x180x1xf32> to vector<180x1xf32>
    %22 = vector.broadcast %21 : vector<180x1xf32> to vector<180x64xf32>
    %23 = arith.mulf %19, %22 : vector<180x64xf32>
    %24 = arith.truncf %23 : vector<180x64xf32> to vector<180x64xbf16>
    %c0_18 = arith.constant 0 : index
    %c0_19 = arith.constant 0 : index
    %25 = vector.load %arg10[%c0_18, %c0_19] : memref<188x64xbf16, #tpu.memory_space<vmem>>, vector<180x64xbf16>
    tpu.vector_store %arg10[%c0_18, %c0_19], %24 {strides = array<i32>} : memref<188x64xbf16, #tpu.memory_space<vmem>>, vector<180x64xbf16>,
    %cst_20 = arith.constant 0.000000e+00 : bf16
    %26 = vector.broadcast %cst_20 : bf16 to vector<8x64xbf16>
    %c180 = arith.constant 180 : index
    %c0_21 = arith.constant 0 : index
    %27 = vector.load %arg10[%c180, %c0_21] : memref<188x64xbf16, #tpu.memory_space<vmem>>, vector<8x64xbf16>
    tpu.vector_store %arg10[%c180, %c0_21], %26 {strides = array<i32>} : memref<188x64xbf16, #tpu.memory_space<vmem>>, vector<8x64xbf16>,
    %cst_22 = arith.constant 0.000000e+00 : f32
    %28 = vector.broadcast %cst_22 : f32 to vector<144x64xf32>
    %c0_23 = arith.constant 0 : index
    %c0_24 = arith.constant 0 : index
    %29 = vector.load %arg10[%c0_23, %c0_24] : memref<188x64xbf16, #tpu.memory_space<vmem>>, vector<144x64xbf16>
    %c0_25 = arith.constant 0 : index
    %c0_26 = arith.constant 0 : index
    %c0_27 = arith.constant 0 : index
    %30 = vector.load %arg6[%c0_25, %c0_26, %c0_27] : memref<9x64x64xbf16, #tpu.memory_space<vmem>>, vector<1x64x64xbf16>
    %31 = vector.shape_cast %30 : vector<1x64x64xbf16> to vector<64x64xbf16>
    %cst_28 = arith.constant dense<0.000000e+00> : vector<144x64xf32>
    %32 = tpu.matmul %29, %31, %cst_28 {dimension_numbers = #tpu.dot_dimension_numbers<[1], [0], [0], [1], [0, 0, 1, 1], [], []>} : vector<144x64xbf16>, vector<64x64xbf16>, vector<144x64xf32> -> vector<144x64xf32>
    %33 = arith.addf %28, %32 : vector<144x64xf32>
    %c1 = arith.constant 1 : index
    %c0_29 = arith.constant 0 : index
    %34 = vector.load %arg10[%c1, %c0_29] : memref<188x64xbf16, #tpu.memory_space<vmem>>, vector<144x64xbf16>
    %c1_30 = arith.constant 1 : index
    %c0_31 = arith.constant 0 : index
    %c0_32 = arith.constant 0 : index
    %35 = vector.load %arg6[%c1_30, %c0_31, %c0_32] : memref<9x64x64xbf16, #tpu.memory_space<vmem>>, vector<1x64x64xbf16>
    %36 = vector.shape_cast %35 : vector<1x64x64xbf16> to vector<64x64xbf16>
    %cst_33 = arith.constant dense<0.000000e+00> : vector<144x64xf32>
    %37 = tpu.matmul %34, %36, %cst_33 {dimension_numbers = #tpu.dot_dimension_numbers<[1], [0], [0], [1], [0, 0, 1, 1], [], []>} : vector<144x64xbf16>, vector<64x64xbf16>, vector<144x64xf32> -> vector<144x64xf32>
    %38 = arith.addf %33, %37 : vector<144x64xf32>
    %c2 = arith.constant 2 : index
    %c0_34 = arith.constant 0 : index
    %39 = vector.load %arg10[%c2, %c0_34] : memref<188x64xbf16, #tpu.memory_space<vmem>>, vector<144x64xbf16>
    %c2_35 = arith.constant 2 : index
    %c0_36 = arith.constant 0 : index
    %c0_37 = arith.constant 0 : index
    %40 = vector.load %arg6[%c2_35, %c0_36, %c0_37] : memref<9x64x64xbf16, #tpu.memory_space<vmem>>, vector<1x64x64xbf16>
    %41 = vector.shape_cast %40 : vector<1x64x64xbf16> to vector<64x64xbf16>
    %cst_38 = arith.constant dense<0.000000e+00> : vector<144x64xf32>
    %42 = tpu.matmul %39, %41, %cst_38 {dimension_numbers = #tpu.dot_dimension_numbers<[1], [0], [0], [1], [0, 0, 1, 1], [], []>} : vector<144x64xbf16>, vector<64x64xbf16>, vector<144x64xf32> -> vector<144x64xf32>
    %43 = arith.addf %38, %42 : vector<144x64xf32>
    %c18 = arith.constant 18 : index
    %c0_39 = arith.constant 0 : index
    %44 = vector.load %arg10[%c18, %c0_39] : memref<188x64xbf16, #tpu.memory_space<vmem>>, vector<144x64xbf16>
    %c3 = arith.constant 3 : index
    %c0_40 = arith.constant 0 : index
    %c0_41 = arith.constant 0 : index
    %45 = vector.load %arg6[%c3, %c0_40, %c0_41] : memref<9x64x64xbf16, #tpu.memory_space<vmem>>, vector<1x64x64xbf16>
    %46 = vector.shape_cast %45 : vector<1x64x64xbf16> to vector<64x64xbf16>
    %cst_42 = arith.constant dense<0.000000e+00> : vector<144x64xf32>
    %47 = tpu.matmul %44, %46, %cst_42 {dimension_numbers = #tpu.dot_dimension_numbers<[1], [0], [0], [1], [0, 0, 1, 1], [], []>} : vector<144x64xbf16>, vector<64x64xbf16>, vector<144x64xf32> -> vector<144x64xf32>
    %48 = arith.addf %43, %47 : vector<144x64xf32>
    %c19 = arith.constant 19 : index
    %c0_43 = arith.constant 0 : index
    %49 = vector.load %arg10[%c19, %c0_43] : memref<188x64xbf16, #tpu.memory_space<vmem>>, vector<144x64xbf16>
    %c4 = arith.constant 4 : index
    %c0_44 = arith.constant 0 : index
    %c0_45 = arith.constant 0 : index
    %50 = vector.load %arg6[%c4, %c0_44, %c0_45] : memref<9x64x64xbf16, #tpu.memory_space<vmem>>, vector<1x64x64xbf16>
    %51 = vector.shape_cast %50 : vector<1x64x64xbf16> to vector<64x64xbf16>
    %cst_46 = arith.constant dense<0.000000e+00> : vector<144x64xf32>
    %52 = tpu.matmul %49, %51, %cst_46 {dimension_numbers = #tpu.dot_dimension_numbers<[1], [0], [0], [1], [0, 0, 1, 1], [], []>} : vector<144x64xbf16>, vector<64x64xbf16>, vector<144x64xf32> -> vector<144x64xf32>
    %53 = arith.addf %48, %52 : vector<144x64xf32>
    %c20 = arith.constant 20 : index
    %c0_47 = arith.constant 0 : index
    %54 = vector.load %arg10[%c20, %c0_47] : memref<188x64xbf16, #tpu.memory_space<vmem>>, vector<144x64xbf16>
    %c5 = arith.constant 5 : index
    %c0_48 = arith.constant 0 : index
    %c0_49 = arith.constant 0 : index
    %55 = vector.load %arg6[%c5, %c0_48, %c0_49] : memref<9x64x64xbf16, #tpu.memory_space<vmem>>, vector<1x64x64xbf16>
    %56 = vector.shape_cast %55 : vector<1x64x64xbf16> to vector<64x64xbf16>
    %cst_50 = arith.constant dense<0.000000e+00> : vector<144x64xf32>
    %57 = tpu.matmul %54, %56, %cst_50 {dimension_numbers = #tpu.dot_dimension_numbers<[1], [0], [0], [1], [0, 0, 1, 1], [], []>} : vector<144x64xbf16>, vector<64x64xbf16>, vector<144x64xf32> -> vector<144x64xf32>
    %58 = arith.addf %53, %57 : vector<144x64xf32>
    %c36 = arith.constant 36 : index
    %c0_51 = arith.constant 0 : index
    %59 = vector.load %arg10[%c36, %c0_51] : memref<188x64xbf16, #tpu.memory_space<vmem>>, vector<144x64xbf16>
    %c6 = arith.constant 6 : index
    %c0_52 = arith.constant 0 : index
    %c0_53 = arith.constant 0 : index
    %60 = vector.load %arg6[%c6, %c0_52, %c0_53] : memref<9x64x64xbf16, #tpu.memory_space<vmem>>, vector<1x64x64xbf16>
    %61 = vector.shape_cast %60 : vector<1x64x64xbf16> to vector<64x64xbf16>
    %cst_54 = arith.constant dense<0.000000e+00> : vector<144x64xf32>
    %62 = tpu.matmul %59, %61, %cst_54 {dimension_numbers = #tpu.dot_dimension_numbers<[1], [0], [0], [1], [0, 0, 1, 1], [], []>} : vector<144x64xbf16>, vector<64x64xbf16>, vector<144x64xf32> -> vector<144x64xf32>
    %63 = arith.addf %58, %62 : vector<144x64xf32>
    %c37 = arith.constant 37 : index
    %c0_55 = arith.constant 0 : index
    %64 = vector.load %arg10[%c37, %c0_55] : memref<188x64xbf16, #tpu.memory_space<vmem>>, vector<144x64xbf16>
    %c7 = arith.constant 7 : index
    %c0_56 = arith.constant 0 : index
    %c0_57 = arith.constant 0 : index
    %65 = vector.load %arg6[%c7, %c0_56, %c0_57] : memref<9x64x64xbf16, #tpu.memory_space<vmem>>, vector<1x64x64xbf16>
    %66 = vector.shape_cast %65 : vector<1x64x64xbf16> to vector<64x64xbf16>
    %cst_58 = arith.constant dense<0.000000e+00> : vector<144x64xf32>
    %67 = tpu.matmul %64, %66, %cst_58 {dimension_numbers = #tpu.dot_dimension_numbers<[1], [0], [0], [1], [0, 0, 1, 1], [], []>} : vector<144x64xbf16>, vector<64x64xbf16>, vector<144x64xf32> -> vector<144x64xf32>
    %68 = arith.addf %63, %67 : vector<144x64xf32>
    %c38 = arith.constant 38 : index
    %c0_59 = arith.constant 0 : index
    %69 = vector.load %arg10[%c38, %c0_59] : memref<188x64xbf16, #tpu.memory_space<vmem>>, vector<144x64xbf16>
    %c8 = arith.constant 8 : index
    %c0_60 = arith.constant 0 : index
    %c0_61 = arith.constant 0 : index
    %70 = vector.load %arg6[%c8, %c0_60, %c0_61] : memref<9x64x64xbf16, #tpu.memory_space<vmem>>, vector<1x64x64xbf16>
    %71 = vector.shape_cast %70 : vector<1x64x64xbf16> to vector<64x64xbf16>
    %cst_62 = arith.constant dense<0.000000e+00> : vector<144x64xf32>
    %72 = tpu.matmul %69, %71, %cst_62 {dimension_numbers = #tpu.dot_dimension_numbers<[1], [0], [0], [1], [0, 0, 1, 1], [], []>} : vector<144x64xbf16>, vector<64x64xbf16>, vector<144x64xf32> -> vector<144x64xf32>
    %73 = arith.addf %68, %72 : vector<144x64xf32>
    %c0_63 = arith.constant 0 : index
    %c0_64 = arith.constant 0 : index
    %74 = vector.load %arg8[%c0_63, %c0_64] : memref<144x1xf32, #tpu.memory_space<vmem>>, vector<144x1xf32>
    %75 = vector.broadcast %74 : vector<144x1xf32> to vector<144x64xf32>
    %76 = arith.mulf %73, %75 : vector<144x64xf32>
    %c0_65 = arith.constant 0 : index
    %c0_66 = arith.constant 0 : index
    %c0_67 = arith.constant 0 : index
    %77 = vector.load %arg9[%c0_65, %c0_66, %c0_67] : memref<1x1x1xf32, #tpu.memory_space<vmem>>, vector<1x1x1xf32>
    %78 = vector.shape_cast %77 : vector<1x1x1xf32> to vector<1x1xf32>
    %79 = arith.mulf %76, %76 : vector<144x64xf32>
    %80 = vector.shape_cast %79 : vector<144x64xf32> to vector<1x144x64xf32>
    %cst_68 = arith.constant dense<0.000000e+00> : vector<1xf32>
    %81 = vector.multi_reduction <add>, %80, %cst_68 [1, 2] : vector<1x144x64xf32> to vector<1xf32>
    %82 = vector.shape_cast %81 : vector<1xf32> to vector<1x1x1xf32>
    %83 = vector.extract %82[0, 0, 0] : f32 from vector<1x1x1xf32>
    %84 = vector.broadcast %83 : f32 to vector<1x1xf32>
    %85 = arith.addf %78, %84 : vector<1x1xf32>
    %c0_69 = arith.constant 0 : index
    %c0_70 = arith.constant 0 : index
    %c0_71 = arith.constant 0 : index
    %86 = vector.load %arg9[%c0_69, %c0_70, %c0_71] : memref<1x1x1xf32, #tpu.memory_space<vmem>>, vector<1x1x1xf32>
    %87 = vector.shape_cast %86 : vector<1x1x1xf32> to vector<1x1xf32>
    %88 = vector.shape_cast %85 : vector<1x1xf32> to vector<1x1x1xf32>
    tpu.vector_store %arg9[%c0_69, %c0_70, %c0_71], %88 {strides = array<i32>} : memref<1x1x1xf32, #tpu.memory_space<vmem>>, vector<1x1x1xf32>,
    return
  }
  func.func @transform_0(%arg0: i32, %arg1: i32) -> (i32, i32, i32, i32) {
    %c0_i32 = arith.constant 0 : i32
    %c0_i32_0 = arith.constant 0 : i32
    %c0_i32_1 = arith.constant 0 : i32
    return %arg0, %arg1, %c0_i32, %c0_i32_0 : i32, i32, i32, i32
  }
  func.func @transform_1(%arg0: i32, %arg1: i32) -> (i32, i32, i32, i32) {
    %c0_i32 = arith.constant 0 : i32
    %c0_i32_0 = arith.constant 0 : i32
    %c0_i32_1 = arith.constant 0 : i32
    return %arg0, %arg1, %c0_i32, %c0_i32_0 : i32, i32, i32, i32
  }
  func.func @transform_2(%arg0: i32, %arg1: i32) -> (i32, i32) {
    %c0_i32 = arith.constant 0 : i32
    %c0_i32_0 = arith.constant 0 : i32
    %c0_i32_1 = arith.constant 0 : i32
    return %c0_i32, %c0_i32_0 : i32, i32
  }
  func.func @transform_3(%arg0: i32, %arg1: i32) -> (i32, i32) {
    %c0_i32 = arith.constant 0 : i32
    %c0_i32_0 = arith.constant 0 : i32
    %c0_i32_1 = arith.constant 0 : i32
    return %c0_i32, %c0_i32_0 : i32, i32
  }
  func.func @transform_4(%arg0: i32, %arg1: i32) -> (i32, i32, i32) {
    %c0_i32 = arith.constant 0 : i32
    %c0_i32_0 = arith.constant 0 : i32
    %c0_i32_1 = arith.constant 0 : i32
    %c0_i32_2 = arith.constant 0 : i32
    return %c0_i32, %c0_i32_0, %c0_i32_1 : i32, i32, i32
  }
  func.func @transform_5(%arg0: i32, %arg1: i32) -> (i32, i32, i32) {
    %c0_i32 = arith.constant 0 : i32
    %c0_i32_0 = arith.constant 0 : i32
    %c0_i32_1 = arith.constant 0 : i32
    return %arg1, %c0_i32, %c0_i32_0 : i32, i32, i32
  }
  func.func @transform_6(%arg0: i32, %arg1: i32) -> (i32, i32) {
    %c0_i32 = arith.constant 0 : i32
    %c0_i32_0 = arith.constant 0 : i32
    %c0_i32_1 = arith.constant 0 : i32
    return %c0_i32, %c0_i32_0 : i32, i32
  }
  func.func @transform_7(%arg0: i32, %arg1: i32) -> (i32, i32, i32) {
    %c0_i32 = arith.constant 0 : i32
    %c0_i32_0 = arith.constant 0 : i32
    %c0_i32_1 = arith.constant 0 : i32
    return %arg0, %c0_i32, %c0_i32_0 : i32, i32, i32
  }
}

</mosaic_0001>

<bundles_post_ra>
// kernel: tpu_custom_call.1
= control target key start
LH: loop header
LB: loop body
LE: loop exit
PB: predicated region body
PF: predicated region fallthrough
CT: control target
= control target key end

     0   :  { %s5133_s24 = smov 0   ;;  %s5135_s25 = smov 0   ;;  %s6396_s0 = inlined_call_operand.vmem [shape: bf16[2,2,180,27], index: 0, kind: input, shape index: {}]   ;;  %s6397_s1 = inlined_call_operand.vmem [shape: bf16[2,2,180,27], index: 1, kind: input, shape index: {}]   ;;  %s6398_s2 = inlined_call_operand.vmem [shape: bf16[27,64], index: 2, kind: input, shape index: {}]   ;;  %s6399_s3 = inlined_call_operand.vmem [shape: f32[1,64], index: 3, kind: input, shape index: {}]   ;;  %s6400_s4 = inlined_call_operand.vmem [shape: bf16[9,64,64], index: 4, kind: input, shape index: {}]   ;;  %s6401_s5 = inlined_call_operand.vmem [shape: f32[2,180,1], index: 5, kind: input, shape index: {}]   ;;  %s6402_s6 = inlined_call_operand.vmem [shape: f32[144,1], index: 6, kind: input, shape index: {}]   ;;  %s6403_s7 = inlined_call_operand.vmem [shape: f32[2,1,1], index: 7, kind: output, shape index: {}]  }
   0x1   :  { %s5137_s26 = smov 0   ;;  %s5139_s27 = smov 0  }
   0x2   :  { %s5141_s28 = smov 0  }
   0x3 LB: > { %s26_s29 = sadd.s32 1, %s5078_s26  ;;  %s29_s30 = sadd.s32 1, %s5082_s27  ;;  %s5086_s28 = sphi %s5141_s28, %s17_s28   ;;  %s5082_s27 = sphi %s5139_s27, %s6426_s27   ;;  %s5078_s26 = sphi %s5137_s26, %s6425_s26   ;;  %s5074_s25 = sphi %s5135_s25, %s6424_s25   ;;  %s5070_s24 = sphi %s5133_s24, %s6423_s24  }
   0x4   : > { %p27_p0 = scmp.ge.s32.totalorder %s26_s29, 2  ;;  %p3708_p1 = scmp.ge.s32.totalorder %s5086_s28, 1 }
   0x5   : > { %p281_p2 = scmp.lt.s32.totalorder %s5086_s28, 5 }
   0x6   : > { %s6428_s29 = smov (%p27_p0, %s26_s29), 0  ;;  %s6430_s30 = smov (!%p27_p0, %s29_s30), %s5082_s27 }
   0x7   : > { %p282_p3 = pnand %p3708_p1, %p281_p2  ;;  %p31_p4 = scmp.ge.s32.totalorder %s6430_s30, 2 }
   0x9   : > { %s6432_s30 = smov (%p31_p4, %s6430_s30), 0  ;;  %285 = sbr.rel (%p282_p3) target bundleno = 1109 (0x455), region = 48 }
   0xa   : > { %6407 = sst [smem:[#allocation3_spill]] %s6432_s30 }
  0x10   : > { %p329_p5 = scmp.lt.s32.totalorder %s5074_s25, 1  ;;  %p331_p6 = scmp.lt.s32.totalorder %s5070_s24, 1 }
  0x11   : > { %p3712_p7 = scmp.ne.s32.totalorder %s5070_s24, 0 }
  0x12   : > { %s6434_s25 = smov (!%p329_p5, %s5074_s25), 1  ;;  %vm360_vm0 = vcmask (!%p3712_p7), 0   ;;  %v5088_v0 = vmov (!%p3712_p7), 0.0  }
  0x13   : > { %s332_s8 = scalar_select %p331_p6, %s5070_s24, 1 }
  0x14   : > { %s4900_s9 = smul.u32 46, %s6434_s25  ;;  %s5170_s12 = scalar_lea.vmem %s6403_s7, %s6434_s25 }
  0x15   : > { %s4899_s13 = smul.u32 23, %s332_s8  ;;  %361 = vst.msk [vmem:[%s5170_s12] sm:$0x1] (!%p3712_p7), %vm360_vm0, %v5088_v0 }
  0x16   : > { %s4901_s14 = smul.u32 184, %s332_s8 }
  0x17   : > { %s335_s15 = sadd.s32 %s4900_s9, %s4899_s13  ;;  %359 = sbr.rel (%p3712_p7) target bundleno = 30 (0x1e), region = 52 }
  0x18   : > { %s3709_s16 = sshll.u32 %s335_s15, 2  ;;  %s5175_s19 = scalar_lea.vmem %s6401_s5, %s4901_s14 }
  0x19   : > { %s5180_s22 = scalar_lea.vmem %s6396_s0, %s3709_s16  ;;  %s5185_s10 = scalar_lea.vmem %s6397_s1, %s3709_s16 }
  0x1e PF: > { %v4951_v1 = vld [vmem:[%s6398_s2] sm:$0xff]   ;;  %vm502_vm1 = vcmask 1044480   ;;  %v4952_v2 = vld [vmem:[%s6398_s2 + $0x8] sm:$0x3f]   ;;  %vm503_vm2 = vcmask 1045504   ;;  %v5089_v3 = vmov 65535  }
  0x1f   : > { %4625 = vmatprep.subr.bf16.mxu1 %v4951_v1  ;;  %4173 = vmatprep.subr.bf16.mxu0 %v4951_v1  ;;  %v504_v4 = vsel %vm502_vm1, 4294967295, %v5089_v3  ;;  %v4953_v5 = vld [vmem:[%s5180_s22 + $0x20] sm:$0xff]   ;;  %vm465_vm3 = vcmask 220160   ;;  %v4954_v8 = vld [vmem:[%s5180_s22 + $0x28] sm:$0xff]   ;;  %vm1228_vm4 = vcmask 517120   ;;  %v4955_v9 = vld [vmem:[%s5180_s22 + $0x30] sm:$0xff]  }
  0x20   : > { %4627 = vmatpush3.bf16.msra.mxu1 %v4951_v1  ;;  %4174 = vmatpush3.bf16.msra.mxu0 %v4951_v1  ;;  %v505_v6 = vsel %vm503_vm2, %v504_v4, 0  ;;  %v5090_v10 = vmov 0   ;;  %v4961_v11 = vld [vmem:[%s5180_s22] sm:$0xff]   ;;  %v4962_v12 = vld [vmem:[%s5180_s22 + $0x8] sm:$0xff]   ;;  %v4965_v13 = vld [vmem:[%s5180_s22 + $0x10] sm:$0xff]   ;;  %vm5092_vm5 = vmmov 0  }
  0x21   : > { %v507_v7 = vand.u32 %v4952_v2, %v505_v6  ;;  %4185 = vmatprep.mubr.msk.bf16.mxu1 %vm465_vm3, %v4953_v5  ;;  %4949 = vset.pattern.permute.xlu0 %v5090_v10  ;;  %v4956_v14 = vld [vmem:[%s5180_s22 + $0x38] sm:$0xff]   ;;  %v4957_v15 = vld [vmem:[%s5180_s22 + $0x40] sm:$0xff]   ;;  %v953_v17 = vld [vmem:[%s5175_s19 + $0x10] sm:$0xff]  ;;  %vm1205_vm6 = vcmask 519168   ;;  %vm1317_vm7 = vsmask.f32 7424 }
  0x22   : > { %4950 = vset.pattern.permute.xlu1 %v5090_v10  ;;  %4177 = vmatprep.mubr.msk.bf16.mxu0 %vm465_vm3, %v4961_v11  ;;  %v4966_v16 = vld [vmem:[%s5180_s22 + $0x18] sm:$0xff]   ;;  %v955_v18 = vld [vmem:[%s5175_s19 + $0x20] sm:$0xff]  ;;  %v4958_v20 = vld [vmem:[%s5180_s22 + $0x48] sm:$0xff]   ;;  %v6404_v10 = vmov 0.0   ;;  %vm1418_vm8 = vcmask 523264   ;;  %vm1711_vm10 = vcmask 1046528  }
  0x23   : > { %4626 = vmatprep.subr.bf16.mxu1 %v507_v7  ;;  %4175 = vmatprep.subr.bf16.mxu0 %v507_v7  ;;  %v954_v19 = vld [vmem:[%s5175_s19 + $0x18] sm:$0xff]  ;;  %v956_v21 = vld [vmem:[%s5175_s19 + $0x28] sm:$0xff]  ;;  %v4959_v22 = vld [vmem:[%s5180_s22 + $0x50] sm:$0xff]   ;;  %vm2187_vm9 = vsmask.f32 6400  ;;  %vm3602_vm12 = vcmask 0  }
  0x24   : > { %4628 = vmatpush3.bf16.msra.mxu1 %v507_v7  ;;  %4176 = vmatpush3.bf16.msra.mxu0 %v507_v7  ;;  %v957_v23 = vld [vmem:[%s5175_s19 + $0x30] sm:$0xff]  ;;  %v958_v24 = vld [vmem:[%s5175_s19 + $0x38] sm:$0xff]  ;;  %v959_v25 = vld [vmem:[%s5175_s19 + $0x40] sm:$0xff]  ;;  %vm2940_vm11 = vsmask.f32 5376 }
  0x25   : > { %4201 = vmatprep.subr.bf16.mxu1 %v4951_v1  ;;  %986 = vperm.xlu0 %4949, %v953_v17   ;;  %v960_v26 = vld [vmem:[%s5175_s19 + $0x48] sm:$0xff]  ;;  %v4960_v27 = vld [vmem:[%s5180_s22 + $0x58] ss:$0 sps:$4 sm:$0x33]   ;;  %v4963_v28 = vld [vmem:[%s5185_s10] sm:$0xff]  }
  0x26   : > { %996 = vperm.xlu1 %4950, %v955_v18   ;;  %v961_v29 = vld [vmem:[%s5175_s19 + $0x50] sm:$0xff]  ;;  %v962_v30 = vld [vmem:[%s5175_s19 + $0x58] sm:$0xff]  ;;  %v4964_v31 = vld [vmem:[%s5185_s10 + $0x8] sm:$0xff]   ;;  %4405 = vmatprep.subr.bf16.mxu0 %v6404_v10 }
  0x27   : > { %4186 = vmatmul.mubr.msk.bf16.vlgmr.msra.gmra.mrb[0].mxu1 %vm465_vm3, %v4954_v8  ;;  %4178 = vmatmul.mubr.msk.bf16.vlgmr.msra.gmra.mrb[0].mxu0 %vm465_vm3, %v4962_v12  ;;  %v963_v32 = vld [vmem:[%s5175_s19 + $0x60] sm:$0xff]  ;;  %v964_v33 = vld [vmem:[%s5175_s19 + $0x68] sm:$0xff]  ;;  %v4967_v34 = vld [vmem:[%s5185_s10 + $0x10] sm:$0xff]  }
  0x28   : > { %4202 = vmatpush3.bf16.msra.mxu1 %v4951_v1  ;;  %4189 = vmatprep.mubr.msk.bf16.mxu1 %vm465_vm3, %v4955_v9  ;;  %v965_v35 = vld [vmem:[%s5175_s19 + $0x70] sm:$0xff]  ;;  %v966_v36 = vld [vmem:[%s5175_s19 + $0x78] sm:$0xff]  ;;  %v967_v37 = vld [vmem:[%s5175_s19 + $0x80] sm:$0xff] }
  0x29   : > { %4203 = vmatprep.subr.bf16.mxu1 %v507_v7  ;;  %4181 = vmatprep.mubr.msk.bf16.mxu0 %vm465_vm3, %v4965_v13  ;;  %v968_v38 = vld [vmem:[%s5175_s19 + $0x88] sm:$0xff]  ;;  %v4968_v39 = vld [vmem:[%s5185_s10 + $0x18] sm:$0xff]   ;;  %v4969_v40 = vld [vmem:[%s5185_s10 + $0x20] sm:$0xff]  }
  0x2a   : > { %991 = vperm.xlu0 %4949, %v954_v19   ;;  %1001 = vperm.xlu1 %4950, %v956_v21   ;;  %v969_v41 = vld [vmem:[%s5175_s19 + $0x90] sm:$0xff]  ;;  %v970_v42 = vld [vmem:[%s5175_s19 + $0x98] sm:$0xff]  ;;  %v971_v43 = vld [vmem:[%s5175_s19 + $0xa0] sm:$0xff] }
  0x2b   : > { %v951_v44 = vld [vmem:[%s5175_s19] sm:$0xff]  ;;  %v4970_v45 = vld [vmem:[%s5185_s10 + $0x28] sm:$0xff]   ;;  %v4971_v46 = vld [vmem:[%s5185_s10 + $0x30] sm:$0xff]  }
  0x2c   : > { %4204 = vmatpush3.bf16.msra.mxu1 %v507_v7  ;;  %v952_v47 = vld [vmem:[%s5175_s19 + $0x8] sm:$0xff]  ;;  %v973_v49 = vld [vmem:[%s5175_s19 + $0xb0] sm:$0xf]  ;;  %v3411_v50 = vld [vmem:[%s6402_s6] sm:$0xff] }
  0x2d   : > { %v972_v48 = vld [vmem:[%s5175_s19 + $0xa8] sm:$0xff]  ;;  %v4972_v51 = vld [vmem:[%s5185_s10 + $0x38] sm:$0xff]   ;;  %v4973_v52 = vld [vmem:[%s5185_s10 + $0x40] sm:$0xff]   ;;  %4229 = vmatprep.subr.bf16.mxu1 %v6404_v10 }
  0x2e   : > { %1006 = vperm.xlu0 %4949, %v957_v23   ;;  %1011 = vperm.xlu1 %4950, %v958_v24   ;;  %v3412_v53 = vld [vmem:[%s6402_s6 + $0x8] sm:$0xff]  ;;  %v3413_v54 = vld [vmem:[%s6402_s6 + $0x10] sm:$0xff]  ;;  %v3414_v55 = vld [vmem:[%s6402_s6 + $0x18] sm:$0xff] }
  0x2f   : > { %4190 = vmatmul.mubr.msk.bf16.gmra.mrb[4].mxu1 %vm465_vm3, %v4956_v14  ;;  %4182 = vmatmul.mubr.msk.bf16.gmra.mrb[4].mxu0 %vm465_vm3, %v4966_v16  ;;  %v3415_v56 = vld [vmem:[%s6402_s6 + $0x20] sm:$0xff]  ;;  %v4974_v57 = vld [vmem:[%s5185_s10 + $0x48] sm:$0xff]   ;;  %v4975_v58 = vld [vmem:[%s5185_s10 + $0x50] sm:$0xff]  }
  0x30   : > { %4193 = vmatprep.mubr.msk.bf16.mxu1 %vm465_vm3, %v4957_v15  ;;  %v3416_v59 = vld [vmem:[%s6402_s6 + $0x28] sm:$0xff]  ;;  %v3417_v60 = vld [vmem:[%s6402_s6 + $0x30] sm:$0xff]  ;;  %v3418_v61 = vld [vmem:[%s6402_s6 + $0x38] sm:$0xff]  ;;  %4413 = vmatprep.mubr.msk.bf16.mxu0 %vm5092_vm5, %v6404_v10 }
  0x31   : > { %v3419_v62 = vld [vmem:[%s6402_s6 + $0x40] sm:$0xff]  ;;  %v4976_v63 = vld [vmem:[%s5185_s10 + $0x58] ss:$0 sps:$4 sm:$0x33]   ;;  %v3420_v0 = vld [vmem:[%s6402_s6 + $0x48] sm:$0xff] }
  0x32   : > { %1016 = vperm.xlu0 %4949, %v959_v25   ;;  %1021 = vperm.xlu1 %4950, %v960_v26   ;;  %v3421_v1 = vld [vmem:[%s6402_s6 + $0x50] sm:$0xff]  ;;  %v3422_v2 = vld [vmem:[%s6402_s6 + $0x58] sm:$0xff]  ;;  %v3423_v3 = vld [vmem:[%s6402_s6 + $0x60] sm:$0xff] }
  0x33   : > { %v3424_v4 = vld [vmem:[%s6402_s6 + $0x68] sm:$0xff]  ;;  %v3425_v5 = vld [vmem:[%s6402_s6 + $0x70] sm:$0xff]  ;;  %v3426_v6 = vld [vmem:[%s6402_s6 + $0x78] sm:$0xff] }
  0x34   : > { %v3427_v7 = vld [vmem:[%s6402_s6 + $0x80] sm:$0xff]  ;;  %v3428_v8 = vld [vmem:[%s6402_s6 + $0x88] sm:$0xff]  ;;  %v4979_v13 = vld [vmem:[%s6400_s4 + $0x30] sm:$0xff]  }
  0x35   : > { %v4977_v9 = vld [vmem:[%s6400_s4 + $0x20] sm:$0xff]   ;;  %v4978_v11 = vld [vmem:[%s6400_s4 + $0x28] sm:$0xff]   ;;  %v4981_v15 = vld [vmem:[%s6400_s4 + $0x38] sm:$0xff]  }
  0x36   : > { %1026 = vperm.xlu0 %4949, %v961_v29   ;;  %1031 = vperm.xlu1 %4950, %v962_v30   ;;  %v4980_v12 = vld [vmem:[%s6400_s4 + $0x80] sm:$0xff]   ;;  %v4982_v14 = vld [vmem:[%s6400_s4 + $0x88] sm:$0xff]   ;;  %v4985_v16 = vld [vmem:[%s6400_s4 + $0x90] sm:$0xff]  }
  0x37   : > { %4194 = vmatmul.mubr.msk.bf16.gmra.mrb[8].mxu1 %vm465_vm3, %v4958_v20  ;;  %4406 = vmatpush3.bf16.msra.mxu0 %v4980_v12  ;;  %v4986_v17 = vld [vmem:[%s6400_s4 + $0x98] sm:$0xff]  }
  0x38   : > { %4197 = vmatprep.mubr.msk.bf16.mxu1 %vm465_vm3, %v4959_v22  ;;  %4407 = vmatprep.subr.bf16.mxu0 %v6404_v10 }
  0x3a   : > { %1036 = vperm.xlu0 %4949, %v963_v32   ;;  %1041 = vperm.xlu1 %4950, %v964_v33  }
  0x3b   : > { %4408 = vmatpush3.bf16.msra.mxu0 %v4982_v14 }
  0x3c   : > { %4409 = vmatprep.subr.bf16.mxu0 %v6404_v10 }
  0x3e   : > { %1046 = vperm.xlu0 %4949, %v965_v35   ;;  %1051 = vperm.xlu1 %4950, %v966_v36  }
  0x3f   : > { %4198 = vmatmul.mubr.msk.bf16.gmra.mrb[12].mxu1 %vm465_vm3, %v4960_v27  ;;  %4410 = vmatpush3.bf16.msra.mxu0 %v4985_v16 }
  0x40   : > { %4205 = vmatprep.mubr.msk.bf16.mxu1 %vm465_vm3, %v4963_v28  ;;  %4411 = vmatprep.subr.bf16.mxu0 %v6404_v10 }
  0x42   : > { %1056 = vperm.xlu0 %4949, %v967_v37   ;;  %1061 = vperm.xlu1 %4950, %v968_v38  }
  0x43   : > { %4412 = vmatpush3.bf16.msra.mxu0 %v4986_v17 }
  0x44   : > { %4449 = vmatprep.subr.bf16.mxu0 %v6404_v10 }
  0x46   : > { %1066 = vperm.xlu0 %4949, %v969_v41   ;;  %1071 = vperm.xlu1 %4950, %v970_v42  }
  0x47   : > { %4206 = vmatmul.mubr.msk.bf16.vlgmr.msra.gmra.mrb[16].mxu1 %vm465_vm3, %v4964_v31 }
  0x48   : > { %4209 = vmatprep.mubr.msk.bf16.mxu1 %vm465_vm3, %v4967_v34  ;;  %4230 = vmatpush3.bf16.msra.mxu1 %v4977_v9 }
  0x49   : > { %4231 = vmatprep.subr.bf16.mxu1 %v6404_v10 }
  0x4a   : > { %1076 = vperm.xlu0 %4949, %v971_v43   ;;  %976 = vperm.xlu1 %4950, %v951_v44  }
  0x4c   : > { %4232 = vmatpush3.bf16.msra.mxu1 %v4978_v11 }
  0x4d   : > { %4233 = vmatprep.subr.bf16.mxu1 %v6404_v10 }
  0x4e   : > { %981 = vperm.xlu0 %4949, %v952_v47   ;;  %1081 = vperm.xlu1 %4950, %v972_v48  }
  0x4f   : > { %4210 = vmatmul.mubr.msk.bf16.gmra.mrb[20].mxu1 %vm465_vm3, %v4968_v39 }
  0x50   : > { %4213 = vmatprep.mubr.msk.bf16.mxu1 %vm465_vm3, %v4969_v40  ;;  %4234 = vmatpush3.bf16.msra.mxu1 %v4979_v13 }
  0x51   : > { %4235 = vmatprep.subr.bf16.mxu1 %v6404_v10 }
  0x52   : > { %1086 = vperm.xlu0 %4949, %v973_v49   ;;  %3431 = vperm.xlu1 %4950, %v3411_v50  }
  0x54   : > { %4236 = vmatpush3.bf16.msra.mxu1 %v4981_v15 }
  0x55   : > { %4273 = vmatprep.subr.bf16.mxu1 %v6404_v10 }
  0x56   : > { %3436 = vperm.xlu0 %4949, %v3412_v53   ;;  %3441 = vperm.xlu1 %4950, %v3413_v54   ;;  %v5407_v54 = vld [vmem:[%s6399_s3] ss:$0 sm:$0xff] }
  0x57   : > { %4214 = vmatmul.mubr.msk.bf16.gmra.mrb[24].mxu1 %vm465_vm3, %v4970_v45 }
  0x58   : > { %4217 = vmatprep.mubr.msk.bf16.mxu1 %vm465_vm3, %v4971_v46 }
  0x5a   : > { %3446 = vperm.xlu0 %4949, %v3414_v55   ;;  %3451 = vperm.xlu1 %4950, %v3415_v56  }
  0x5e   : > { %3456 = vperm.xlu0 %4949, %v3416_v59   ;;  %3461 = vperm.xlu1 %4950, %v3417_v60  }
  0x5f   : > { %4218 = vmatmul.mubr.msk.bf16.gmra.mrb[28].mxu1 %vm465_vm3, %v4972_v51 }
  0x60   : > { %4221 = vmatprep.mubr.msk.bf16.mxu1 %vm465_vm3, %v4973_v52 }
  0x62   : > { %3466 = vperm.xlu0 %4949, %v3418_v61   ;;  %3471 = vperm.xlu1 %4950, %v3419_v62  }
  0x66   : > { %3476 = vperm.xlu0 %4949, %v3420_v0   ;;  %3481 = vperm.xlu1 %4950, %v3421_v1  }
  0x67   : > { %4222 = vmatmul.mubr.msk.bf16.gmra.mrb[32].mxu1 %vm465_vm3, %v4974_v57 }
  0x68   : > { %4225 = vmatprep.mubr.msk.bf16.mxu1 %vm465_vm3, %v4975_v58 }
  0x6a   : > { %3486 = vperm.xlu0 %4949, %v3422_v2   ;;  %3491 = vperm.xlu1 %4950, %v3423_v3  }
  0x6e   : > { %3496 = vperm.xlu0 %4949, %v3424_v4   ;;  %3501 = vperm.xlu1 %4950, %v3425_v5  }
  0x6f   : > { %4226 = vmatmul.mubr.msk.bf16.gmra.mrb[36].mxu1 %vm465_vm3, %v4976_v63 }
  0x70   : > { %4237 = vmatprep.mubr.msk.bf16.mxu1 %vm5092_vm5, %v6404_v10 }
  0x72   : > { %3506 = vperm.xlu0 %4949, %v3426_v6   ;;  %3511 = vperm.xlu1 %4950, %v3427_v7  }
  0x76   : > { %3516 = vperm.xlu0 %4949, %v3428_v8  }
  0xa4   : > { %v5360_v18 = vpop.permute.xlu0 %986 }
  0xa5   : > { %v5362_v19 = vpop.permute.xlu1 %996 }
  0xa9   : > { %v5364_v20 = vpop.permute.xlu0 %991  ;;  %v5366_v21 = vpop.permute.xlu1 %1001 }
  0xad   : > { %v5368_v22 = vpop.permute.xlu0 %1006  ;;  %v5370_v23 = vpop.permute.xlu1 %1011 }
  0xb1   : > { %v5372_v24 = vpop.permute.xlu0 %1016  ;;  %v5374_v27 = vpop.permute.xlu1 %1021 }
  0xb5   : > { %v5376_v31 = vpop.permute.xlu0 %1026  ;;  %v5378_v36 = vpop.permute.xlu1 %1031 }
  0xb9   : > { %v5380_v38 = vpop.permute.xlu0 %1036  ;;  %v5386_v45 = vpop.permute.xlu1 %1041 }
  0xbd   : > { %v5390_v47 = vpop.permute.xlu0 %1046  ;;  %v5398_v51 = vpop.permute.xlu1 %1051 }
  0xc1   : > { %v5400_v52 = vpop.permute.xlu0 %1056  ;;  %v5411_v57 = vpop.permute.xlu1 %1061 }
  0xc5   : > { %v5418_v60 = vpop.permute.xlu0 %1066  ;;  %v5434_v6 = vpop.permute.xlu1 %1071 }
  0xc9   : > { %v5443_v17 = vpop.permute.xlu0 %1076 }
  0xfa   : > { %v4187_v25 = vpop.f32.mrb[0].mxu1  ;;  %v4179_v30 = vpop.f32.mrb[0].mxu0 }
  0xfb   : > { %v575_v26 = vpop.f32.mrb[1].mxu1  ;;  %v543_v32 = vpop.f32.mrb[1].mxu0  ;;  %v5416_v59 = vadd.f32 %v4187_v25, %v5407_v54  ;;  %v552_v62 = vadd.f32 %v4179_v30, %v5407_v54 }
  0xfc   : > { %v4188_v28 = vpop.f32.mrb[2].mxu1  ;;  %v4180_v33 = vpop.f32.mrb[2].mxu0  ;;  %v5421_v61 = vadd.f32 %v5407_v54, %v575_v26  ;;  %v544_v0 = vadd.f32 %v5407_v54, %v543_v32 }
  0xfd   : > { %v578_v29 = vpop.f32.mrb[3].mxu1  ;;  %v546_v34 = vpop.f32.mrb[3].mxu0  ;;  %v5425_v63 = vadd.f32 %v4188_v28, %v5407_v54  ;;  %v647_v2 = vmax.f32 %v5416_v59, 0.0  ;;  %v555_v3 = vadd.f32 %v4180_v33, %v5407_v54  ;;  %v639_v7 = vmax.f32 %v552_v62, 0.0 }
  0xfe   : > { %v5429_v1 = vadd.f32 %v5407_v54, %v578_v29  ;;  %v645_v5 = vmax.f32 %v5421_v61, 0.0  ;;  %v547_v9 = vadd.f32 %v5407_v54, %v546_v34  ;;  %v637_v14 = vmax.f32 %v544_v0, 0.0 }
  0xff   : > { %v648_v12 = vmax.f32 %v5425_v63, 0.0  ;;  %v640_v32 = vmax.f32 %v555_v3, 0.0 }
 0x100   : > { %v638_v62 = vmax.f32 %v547_v9, 0.0 }
 0x102   : > { %v4191_v35 = vpop.f32.mrb[4].mxu1  ;;  %v4183_v41 = vpop.f32.mrb[4].mxu0 }
 0x103   : > { %v591_v37 = vpop.f32.mrb[5].mxu1  ;;  %v559_v42 = vpop.f32.mrb[5].mxu0  ;;  %v5440_v13 = vadd.f32 %v4191_v35, %v5407_v54  ;;  %v568_v35 = vadd.f32 %v4183_v41, %v5407_v54 }
 0x104   : > { %v4192_v39 = vpop.f32.mrb[6].mxu1  ;;  %v5382_v43 = vpop.f32.mrb[6].mxu0  ;;  %v5447_v26 = vadd.f32 %v5407_v54, %v591_v37 }
 0x105   : > { %v594_v40 = vpop.f32.mrb[7].mxu1  ;;  %v5384_v44 = vpop.f32.mrb[7].mxu0  ;;  %v5455_v37 = vadd.f32 %v4192_v39, %v5407_v54 }
 0x106   : > { %v982_v39 = vpop.permute.xlu0 %981 }
 0x10a   : > { %v5388_v46 = vpop.f32.mrb[8].mxu1 }
 0x10b   : > { %v5392_v48 = vpop.f32.mrb[9].mxu1 }
 0x10c   : > { %v5394_v49 = vpop.f32.mrb[10].mxu1 }
 0x10d   : > { %v5396_v50 = vpop.f32.mrb[11].mxu1 }
 0x112   : > { %v5402_v53 = vpop.f32.mrb[12].mxu1 }
 0x113   : > { %v5409_v55 = vpop.f32.mrb[13].mxu1 }
 0x114   : > { %v4200_v56 = vpop.f32.mrb[14].mxu1 }
 0x115   : > { %v5413_v58 = vpop.f32.mrb[15].mxu1 }
 0x11a   : > { %v4207_v4 = vpop.f32.mrb[16].mxu1 }
 0x11b   : > { %v820_v8 = vadd.f32 %v4207_v4, %v5407_v54  ;;  %v811_v11 = vpop.f32.mrb[17].mxu1  ;;  %v560_v4 = vadd.f32 %v5407_v54, %v559_v42  ;;  %v571_v42 = vadd.f32 %v5382_v43, %v5407_v54  ;;  %v5471_v43 = vadd.f32 %v5388_v46, %v5407_v54 }
 0x11c   : > { %v812_v15 = vadd.f32 %v5407_v54, %v811_v11  ;;  %v4208_v16 = vpop.f32.mrb[18].mxu1  ;;  %v652_v46 = vmax.f32 %v5455_v37, 0.0 }
 0x11d   : > { %v907_v28 = vmax.f32 %v820_v8, 0.0  ;;  %v823_v29 = vadd.f32 %v4208_v16, %v5407_v54  ;;  %v814_v30 = vpop.f32.mrb[19].mxu1  ;;  %v977_v16 = vpop.permute.xlu1 %976 }
 0x11e   : > { %v905_v33 = vmax.f32 %v812_v15, 0.0  ;;  %v815_v34 = vadd.f32 %v5407_v54, %v814_v30  ;;  %v5459_v15 = vadd.f32 %v5407_v54, %v594_v40 }
 0x11f   : > { %v930_v56 = vsub.f32 %v639_v7, %v907_v28  ;;  %v908_v0 = vmax.f32 %v823_v29, 0.0  ;;  %v643_v29 = vmax.f32 %v568_v35, 0.0 }
 0x120   : > { %v928_v8 = vsub.f32 %v637_v14, %v905_v33  ;;  %v906_v10 = vmax.f32 %v815_v34, 0.0  ;;  %v641_v33 = vmax.f32 %v560_v4, 0.0 }
 0x121   : > { %v1091_v41 = vmul.f32 %v5360_v18, %v930_v56  ;;  %v931_v7 = vsub.f32 %v640_v32, %v908_v0  ;;  %v563_v18 = vadd.f32 %v5407_v54, %v5384_v44  ;;  %v5477_v0 = vadd.f32 %v5407_v54, %v5392_v48 }
 0x122   : > { %v1089_v9 = vmul.f32 %v977_v16, %v928_v8  ;;  %v929_v28 = vsub.f32 %v638_v62, %v906_v10  ;;  %v4211_v30 = vpop.f32.mrb[20].mxu1 }
 0x123   : > { %v4007_v11 = vpack.c.bf16 %v1091_v41, %v1091_v41  ;;  %v1092_v14 = vmul.f32 %v5364_v20, %v931_v7  ;;  %v836_v34 = vadd.f32 %v4211_v30, %v5407_v54  ;;  %v827_v3 = vpop.f32.mrb[21].mxu1  ;;  %v5485_v41 = vadd.f32 %v5394_v49, %v5407_v54 }
 0x124   : > { %v4005_v40 = vpack.c.bf16 %v1089_v9, %v1089_v9  ;;  %v1090_v25 = vmul.f32 %v982_v39, %v929_v28  ;;  %v828_v10 = vadd.f32 %v5407_v54, %v827_v3  ;;  %v4212_v32 = vpop.f32.mrb[22].mxu1  ;;  %v642_v48 = vmax.f32 %v563_v18, 0.0 }
 0x125   : > { %1208 = vst.msk [vmem:[#allocation2 + $0x8] sm:$0xf] %vm1205_vm6, %v4007_v11  ;;  %v4008_v35 = vpack.c.bf16 %v1092_v14, %v1092_v14  ;;  %v911_v20 = vmax.f32 %v836_v34, 0.0  ;;  %v839_v56 = vadd.f32 %v4212_v32, %v5407_v54  ;;  %v830_v62 = vpop.f32.mrb[23].mxu1  ;;  %v644_v11 = vmax.f32 %v571_v42, 0.0 }
 0x126   : > { %1206 = vst.msk [vmem:[#allocation2] sm:$0xf] %vm1205_vm6, %v4005_v40  ;;  %v4006_v44 = vpack.c.bf16 %v1090_v25, %v1090_v25  ;;  %v909_v4 = vmax.f32 %v828_v10, 0.0  ;;  %v831_v8 = vadd.f32 %v5407_v54, %v830_v62  ;;  %v650_v25 = vmax.f32 %v5459_v15, 0.0 }
 0x127   : > { %1209 = vst.msk [vmem:[#allocation2 + $0xc] sm:$0xf] %vm1205_vm6, %v4008_v35  ;;  %v934_v16 = vsub.f32 %v643_v29, %v911_v20  ;;  %v912_v3 = vmax.f32 %v839_v56, 0.0  ;;  %v5491_v28 = vadd.f32 %v5407_v54, %v5396_v50  ;;  %v655_v29 = vmax.f32 %v5471_v43, 0.0 }
 0x128   : > { %1207 = vst.msk [vmem:[#allocation2 + $0x4] sm:$0xf] %vm1205_vm6, %v4006_v44  ;;  %v932_v7 = vsub.f32 %v641_v33, %v909_v4  ;;  %v910_v9 = vmax.f32 %v831_v8, 0.0  ;;  %v653_v39 = vmax.f32 %v5477_v0, 0.0  ;;  %v5499_v33 = vadd.f32 %v5402_v53, %v5407_v54 }
 0x129   : > { %v1095_v30 = vmul.f32 %v5368_v22, %v934_v16  ;;  %v935_v42 = vsub.f32 %v644_v11, %v912_v3  ;;  %v656_v22 = vmax.f32 %v5485_v41, 0.0  ;;  %v654_v56 = vmax.f32 %v5491_v28, 0.0 }
 0x12a   : > { %v1093_v49 = vmul.f32 %v5362_v19, %v932_v7  ;;  %v933_v14 = vsub.f32 %v642_v48, %v910_v9  ;;  %v4215_v34 = vpop.f32.mrb[24].mxu1  ;;  %v659_v48 = vmax.f32 %v5499_v33, 0.0 }
 0x12b   : > { %v4011_v40 = vpack.c.bf16 %v1095_v30, %v1095_v30  ;;  %v1096_v18 = vmul.f32 %v5370_v23, %v935_v42  ;;  %v852_v50 = vadd.f32 %v4215_v34, %v5407_v54  ;;  %v843_v10 = vpop.f32.mrb[25].mxu1 }
 0x12c   : > { %v4009_v32 = vpack.c.bf16 %v1093_v49, %v1093_v49  ;;  %v1094_v35 = vmul.f32 %v5366_v21, %v933_v14  ;;  %v844_v20 = vadd.f32 %v5407_v54, %v843_v10  ;;  %v4216_v19 = vpop.f32.mrb[26].mxu1  ;;  %v1905_v4 = vld [vmem:[#allocation2 + $0x8] sm:$0xe] }
 0x12d   : > { %1212 = vst.msk [vmem:[#allocation2 + $0x18] sm:$0xf] %vm1205_vm6, %v4011_v40  ;;  %v4012_v53 = vpack.c.bf16 %v1096_v18, %v1096_v18  ;;  %v915_v62 = vmax.f32 %v852_v50, 0.0  ;;  %v855_v44 = vadd.f32 %v4216_v19, %v5407_v54  ;;  %v846_v23 = vpop.f32.mrb[27].mxu1  ;;  %v1233_v30 = vld [vmem:[#allocation2] sm:$0xf] }
 0x12e   : > { %1210 = vst.msk [vmem:[#allocation2 + $0x10] sm:$0xf] %vm1205_vm6, %v4009_v32  ;;  %v4010_v8 = vpack.c.bf16 %v1094_v35, %v1094_v35  ;;  %v913_v11 = vmax.f32 %v844_v20, 0.0  ;;  %v847_v21 = vadd.f32 %v5407_v54, %v846_v23  ;;  %v5511_v16 = vld [vmem:[#allocation2 + $0x8] sm:$0xff]   ;;  %v6408_v35 = vmax.f32 %v5429_v1, 0.0 }
 0x12f   : > { %v5513_v3 = vld [vmem:[#allocation2 + $0xc] sm:$0xf]  ;;  %1213 = vst.msk [vmem:[#allocation2 + $0x1c] sm:$0xf] %vm1205_vm6, %v4012_v53  ;;  %v938_v7 = vsub.f32 %v647_v2, %v915_v62  ;;  %v916_v9 = vmax.f32 %v855_v44, 0.0  ;;  %v1326_v18 = vshll.u32 %v5511_v16, 16 }
 0x130   : > { %v1234_v42 = vld [vmem:[#allocation2 + $0x4] sm:$0xf]  ;;  %v5520_v49 = vcombine.low %v1905_v4, %v5513_v3  ;;  %1211 = vst.msk [vmem:[#allocation2 + $0x14] sm:$0xf] %vm1205_vm6, %v4010_v8  ;;  %v936_v14 = vsub.f32 %v645_v5, %v913_v11  ;;  %v914_v34 = vmax.f32 %v847_v21, 0.0  ;;  %v1330_v2 = vshrl.u32 %v5511_v16, 16 }
 0x131   : > { %v5525_v40 = vcombine.low %v1233_v30, %v1234_v42  ;;  %v1099_v50 = vmul.f32 %v5376_v31, %v938_v7  ;;  %v939_v59 = vsub.f32 %v648_v12, %v916_v9  ;;  %v1328_v62 = vrot.slane %v1326_v18, 1 }
 0x132   : > { %v2189_v10 = vshrl.u32 %v5520_v49, 16  ;;  %v1097_v32 = vmul.f32 %v5372_v24, %v936_v14  ;;  %v937_v61 = vsub.f32 %v6408_v35, %v914_v34  ;;  %v4219_v5 = vpop.f32.mrb[28].mxu1  ;;  %v5544_v8 = vadd.f32 %v5407_v54, %v5409_v55  ;;  %v5005_v14 = vld [vmem:[%s6400_s4] sm:$0xff]  }
 0x133   : > { %v1319_v20 = vshrl.u32 %v5525_v40, 16  ;;  %v1321_v19 = vshll.u32 %v5525_v40, 16  ;;  %v4015_v53 = vpack.c.bf16 %v1099_v50, %v1099_v50  ;;  %v1100_v31 = vmul.f32 %v5378_v36, %v939_v59  ;;  %v859_v12 = vpop.f32.mrb[29].mxu1 }
 0x134   : > { %v868_v63 = vadd.f32 %v4219_v5, %v5407_v54  ;;  %v4013_v44 = vpack.c.bf16 %v1097_v32, %v1097_v32  ;;  %v1098_v23 = vmul.f32 %v5374_v27, %v937_v61  ;;  %v860_v24 = vadd.f32 %v5407_v54, %v859_v12  ;;  %v4220_v4 = vpop.f32.mrb[30].mxu1 }
 0x135   : > { %v1323_v1 = vrot.slane %v1321_v19, 1  ;;  %1216 = vst.msk [vmem:[#allocation2 + $0x28] sm:$0xf] %vm1205_vm6, %v4015_v53  ;;  %v4016_v11 = vpack.c.bf16 %v1100_v31, %v1100_v31  ;;  %v871_v36 = vadd.f32 %v4220_v4, %v5407_v54  ;;  %v862_v7 = vpop.f32.mrb[31].mxu1  ;;  %v5555_v55 = vadd.f32 %v5407_v54, %v5413_v58 }
 0x136   : > { %v919_v21 = vmax.f32 %v868_v63, 0.0  ;;  %1214 = vst.msk [vmem:[#allocation2 + $0x20] sm:$0xf] %vm1205_vm6, %v4013_v44  ;;  %v4014_v9 = vpack.c.bf16 %v1098_v23, %v1098_v23  ;;  %v917_v30 = vmax.f32 %v860_v24, 0.0  ;;  %v863_v27 = vadd.f32 %v5407_v54, %v862_v7  ;;  %v5588_v23 = vld [vmem:[#allocation2 + $0x18] sm:$0xff]  }
 0x137   : > { %v1324_v42 = vor.u32 %v1323_v1, %v1319_v20  ;;  %1217 = vst.msk [vmem:[#allocation2 + $0x2c] sm:$0xf] %vm1205_vm6, %v4016_v11  ;;  %v6409_v34 = vmax.f32 %v5440_v13, 0.0  ;;  %v920_v50 = vmax.f32 %v871_v36, 0.0  ;;  %v5560_v59 = vld [vmem:[#allocation2 + $0x10] sm:$0xff]   ;;  %v1332_v32 = vor.u32 %v1330_v2, %v1328_v62  ;;  %v5590_v24 = vld [vmem:[#allocation2 + $0x18] sm:$0xff]  }
 0x138   : > { %1215 = vst.msk [vmem:[#allocation2 + $0x24] sm:$0xf] %vm1205_vm6, %v4014_v9  ;;  %v6410_v35 = vmax.f32 %v5447_v26, 0.0  ;;  %v918_v5 = vmax.f32 %v863_v27, 0.0  ;;  %v5566_v19 = vld [vmem:[#allocation2 + $0x10] sm:$0xff]   ;;  %v5568_v58 = vrot.slane %v2189_v10, 1 }
 0x139   : > { %v942_v18 = vsub.f32 %v6409_v34, %v919_v21  ;;  %v1329_v20 = vsel %vm1317_vm7, %v1324_v42, %v1328_v62  ;;  %v943_v53 = vsub.f32 %v652_v46, %v920_v50  ;;  %v1334_v2 = vshll.u32 %v5560_v59, 16  ;;  %v5006_v46 = vld [vmem:[%s6400_s4 + $0x8] sm:$0xff]  }
 0x13a   : > { %v940_v61 = vsub.f32 %v6410_v35, %v917_v30  ;;  %4238 = vmatmul.mubr.msk.bf16.vlgmr.msra.gmra.mrb[40].mxu1 %vm1418_vm8, %v1329_v20  ;;  %v2192_v26 = vshll.u32 %v5520_v49, 16  ;;  %v941_v63 = vsub.f32 %v650_v25, %v918_v5  ;;  %v4223_v12 = vpop.f32.mrb[32].mxu1  ;;  %v6411_v62 = vmov 0.0  }
 0x13b   : > { %v1103_v13 = vmul.f32 %v5390_v47, %v942_v18  ;;  %4241 = vmatprep.mubr.msk.bf16.mxu1 %vm5092_vm5, %v6411_v62  ;;  %v2197_v47 = vshrl.u32 %v5566_v19, 16  ;;  %v2200_v37 = vshll.u32 %v5566_v19, 16  ;;  %4274 = vmatpush3.bf16.msra.mxu1 %v5005_v14  ;;  %v1104_v44 = vmul.f32 %v5398_v51, %v943_v53  ;;  %v875_v15 = vpop.f32.mrb[33].mxu1  ;;  %v5010_v18 = vld [vmem:[%s6400_s4 + $0x10] sm:$0xff]  }
 0x13c   : > { %v1101_v31 = vmul.f32 %v5380_v38, %v940_v61  ;;  %v884_v38 = vadd.f32 %v4223_v12, %v5407_v54  ;;  %v1336_v25 = vrot.slane %v1334_v2, 1  ;;  %4275 = vmatprep.subr.bf16.mxu1 %v6411_v62  ;;  %v1102_v1 = vmul.f32 %v5386_v45, %v941_v63  ;;  %v4224_v21 = vpop.f32.mrb[34].mxu1  ;;  %v4990_v2 = vld [vmem:[%s6400_s4 + $0xa0] sm:$0xff]   ;;  %v5011_v63 = vld [vmem:[%s6400_s4 + $0x18] sm:$0xff]  }
 0x13d   : > { %v4019_v10 = vpack.c.bf16 %v1103_v13, %v1103_v13  ;;  %v876_v11 = vadd.f32 %v5407_v54, %v875_v15  ;;  %v2194_v36 = vrot.slane %v2192_v26, 2  ;;  %v4020_v51 = vpack.c.bf16 %v1104_v44, %v1104_v44  ;;  %v878_v30 = vpop.f32.mrb[35].mxu1 }
 0x13e   : > { %v4017_v4 = vpack.c.bf16 %v1101_v31, %v1101_v31  ;;  %v923_v7 = vmax.f32 %v884_v38, 0.0  ;;  %v887_v9 = vadd.f32 %v4224_v21, %v5407_v54  ;;  %v1337_v27 = vsel %vm1317_vm7, %v1332_v32, %v1336_v25 }
 0x13f   : > { %1220 = vst.msk [vmem:[#allocation2 + $0x38] sm:$0xf] %vm1205_vm6, %v4019_v10  ;;  %v4018_v42 = vpack.c.bf16 %v1102_v1, %v1102_v1  ;;  %v921_v14 = vmax.f32 %v876_v11, 0.0  ;;  %v879_v34 = vadd.f32 %v5407_v54, %v878_v30  ;;  %v2195_v45 = vor.u32 %v2194_v36, %v5568_v58  ;;  %4276 = vmatpush3.bf16.msra.mxu1 %v5006_v46 }
 0x140   : > { %1218 = vst.msk [vmem:[#allocation2 + $0x30] sm:$0xf] %vm1205_vm6, %v4017_v4  ;;  %1221 = vst.msk [vmem:[#allocation2 + $0x3c] sm:$0xf] %vm1205_vm6, %v4020_v51  ;;  %v946_v50 = vsub.f32 %v655_v29, %v923_v7  ;;  %v924_v35 = vmax.f32 %v887_v9, 0.0  ;;  %v2199_v32 = vrot.slane %v2197_v47, 1  ;;  %4277 = vmatprep.subr.bf16.mxu1 %v6411_v62 }
 0x141   : > { %v2202_v61 = vrot.slane %v2200_v37, 2  ;;  %1219 = vst.msk [vmem:[#allocation2 + $0x34] sm:$0xf] %vm1205_vm6, %v4018_v42  ;;  %v944_v5 = vsub.f32 %v653_v39, %v921_v14  ;;  %v922_v20 = vmax.f32 %v879_v34, 0.0  ;;  %v1338_v58 = vshrl.u32 %v5560_v59, 16  ;;  %v5638_v47 = vld [vmem:[#allocation2 + $0x20] sm:$0xff]  }
 0x142   : > { %v1342_v13 = vshll.u32 %v5588_v23, 16  ;;  %v1107_v53 = vmul.f32 %v5418_v60, %v946_v50  ;;  %v947_v43 = vsub.f32 %v656_v22, %v924_v35  ;;  %4242 = vmatmul.mubr.msk.bf16.gmra.mrb[44].mxu1 %vm1418_vm8, %v1337_v27  ;;  %v2206_v0 = vshrl.u32 %v5590_v24, 16  ;;  %v4227_v31 = vpop.f32.mrb[36].mxu1  ;;  %v5629_v22 = vld [vmem:[#allocation2 + $0x20] sm:$0xff]   ;;  %v4995_v37 = vld [vmem:[%s6400_s4 + $0xa8] sm:$0xff]  }
 0x143   : > { %v5617_v29 = vor.u32 %v2202_v61, %v2199_v32  ;;  %v657_v39 = vmax.f32 %v5544_v8, 0.0  ;;  %v1105_v26 = vmul.f32 %v5400_v52, %v944_v5  ;;  %v945_v60 = vsub.f32 %v654_v56, %v922_v20  ;;  %4245 = vmatprep.mubr.msk.bf16.mxu1 %vm5092_vm5, %v6411_v62  ;;  %4278 = vmatpush3.bf16.msra.mxu1 %v5010_v18  ;;  %v891_v56 = vpop.f32.mrb[37].mxu1  ;;  %v5671_v35 = vld [vmem:[#allocation2 + $0x28] sm:$0xff]   ;;  %v1082_v32 = vpop.permute.xlu1 %1081 }
 0x144   : > { %v1340_v41 = vor.u32 %v1338_v58, %v1336_v25  ;;  %v4023_v12 = vpack.c.bf16 %v1107_v53, %v1107_v53  ;;  %v1108_v8 = vmul.f32 %v5434_v6, %v947_v43  ;;  %v900_v28 = vadd.f32 %v4227_v31, %v5407_v54  ;;  %4279 = vmatprep.subr.bf16.mxu1 %v6411_v62  ;;  %v4228_v44 = vpop.f32.mrb[38].mxu1 }
 0x145   : > { %v2204_v52 = vsel %vm2187_vm9, %v2195_v45, %v5617_v29  ;;  %v4021_v46 = vpack.c.bf16 %v1105_v26, %v1105_v26  ;;  %v1106_v10 = vmul.f32 %v5411_v57, %v945_v60  ;;  %v892_v6 = vadd.f32 %v5407_v54, %v891_v56  ;;  %v894_v4 = vpop.f32.mrb[39].mxu1 }
 0x146   : > { %4414 = vmatmul.mubr.msk.bf16.vlgmr.msra.gmra.mrb[8].mxu0 %vm1418_vm8, %v2204_v52  ;;  %v1344_v38 = vrot.slane %v1342_v13, 1  ;;  %1224 = vst.msk [vmem:[#allocation2 + $0x48] sm:$0xf] %vm1205_vm6, %v4023_v12  ;;  %v4024_v15 = vpack.c.bf16 %v1108_v8, %v1108_v8  ;;  %v927_v25 = vmax.f32 %v900_v28, 0.0  ;;  %v2208_v1 = vrot.slane %v2206_v0, 1 }
 0x147   : > { %4450 = vmatpush3.bf16.msra.mxu0 %v4990_v2  ;;  %4417 = vmatprep.mubr.msk.bf16.mxu0 %vm5092_vm5, %v6411_v62  ;;  %v2209_v11 = vshll.u32 %v5590_v24, 16  ;;  %v658_v57 = vmax.f32 %v5555_v55, 0.0  ;;  %1222 = vst.msk [vmem:[#allocation2 + $0x40] sm:$0xf] %vm1205_vm6, %v4021_v46  ;;  %v4022_v21 = vpack.c.bf16 %v1106_v10, %v1106_v10  ;;  %v925_v36 = vmax.f32 %v892_v6, 0.0  ;;  %v1087_v55 = vpop.permute.xlu0 %1086  ;;  %v5681_v2 = vld [vmem:[#allocation2 + $0x28] sm:$0xff]  }
 0x148   : > { %v895_v51 = vadd.f32 %v5407_v54, %v894_v4  ;;  %4451 = vmatprep.subr.bf16.mxu0 %v6411_v62  ;;  %4280 = vmatpush3.bf16.msra.mxu1 %v5011_v63  ;;  %1225 = vst.msk [vmem:[#allocation2 + $0x4c] sm:$0xf] %vm1205_vm6, %v4024_v15  ;;  %v950_v7 = vsub.f32 %v659_v48, %v927_v25  ;;  %v2215_v27 = vshrl.u32 %v5638_v47, 16  ;;  %v1350_v14 = vshll.u32 %v5629_v22, 16  ;;  %v5000_v48 = vld [vmem:[%s6400_s4 + $0xb0] sm:$0xff]   ;;  %v5701_v28 = vld [vmem:[#allocation2 + $0x38] sm:$0xff]  }
 0x149   : > { %v1345_v9 = vsel %vm1317_vm7, %v1340_v41, %v1344_v38  ;;  %v2211_v30 = vrot.slane %v2209_v11, 2  ;;  %4317 = vmatprep.subr.bf16.mxu1 %v6411_v62  ;;  %1223 = vst.msk [vmem:[#allocation2 + $0x44] sm:$0xf] %vm1205_vm6, %v4022_v21  ;;  %v948_v42 = vsub.f32 %v657_v39, %v925_v36  ;;  %v2218_v34 = vshll.u32 %v5638_v47, 16  ;;  %v5690_v41 = vld [vmem:[#allocation2 + $0x30] sm:$0xff]   ;;  %v5711_v4 = vld [vmem:[#allocation2 + $0x38] sm:$0xff]  }
 0x14a   : > { %v926_v54 = vmax.f32 %v895_v51, 0.0  ;;  %v1111_v45 = vmul.f32 %v1087_v55, %v950_v7  ;;  %4246 = vmatmul.mubr.msk.bf16.gmra.mrb[48].mxu1 %vm1418_vm8, %v1345_v9  ;;  %v2217_v20 = vrot.slane %v2215_v27, 1  ;;  %v1352_v43 = vrot.slane %v1350_v14, 1  ;;  %v5694_v12 = vld [vmem:[#allocation2 + $0x30] sm:$0xff]  }
 0x14b   : > { %v2212_v33 = vor.u32 %v2211_v30, %v2208_v1  ;;  %4452 = vmatpush3.bf16.msra.mxu0 %v4995_v37  ;;  %v1109_v18 = vmul.f32 %v5443_v17, %v948_v42  ;;  %4249 = vmatprep.mubr.msk.bf16.mxu1 %vm5092_vm5, %v6411_v62  ;;  %v2220_v58 = vrot.slane %v2218_v34, 2  ;;  %v1346_v17 = vshrl.u32 %v5588_v23, 16 }
 0x14c   : > { %v949_v50 = vsub.f32 %v658_v57, %v926_v54  ;;  %4453 = vmatprep.subr.bf16.mxu0 %v6411_v62  ;;  %v4027_v61 = vpack.c.bf16 %v1111_v45, %v1111_v45  ;;  %v2224_v60 = vshrl.u32 %v5671_v35, 16  ;;  %v2227_v31 = vshll.u32 %v5671_v35, 16 }
 0x14d   : > { %v2213_v5 = vsel %vm2187_vm9, %v5617_v29, %v2212_v33  ;;  %v4025_v13 = vpack.c.bf16 %v1109_v18, %v1109_v18  ;;  %v5007_v29 = vld [vmem:[%s6400_s4 + $0xb8] sm:$0xff]   ;;  %v1348_v39 = vor.u32 %v1346_v17, %v1344_v38  ;;  %v2221_v26 = vor.u32 %v2220_v58, %v2217_v20  ;;  %v2451_v38 = vld [vmem:[#allocation2 + $0x8] sm:$0xc] }
 0x14e   : > { %v1110_v53 = vmul.f32 %v1082_v32, %v949_v50  ;;  %4418 = vmatmul.mubr.msk.bf16.gmra.mrb[12].mxu0 %vm1418_vm8, %v2213_v5  ;;  %1229 = vst.msk [vmem:[#allocation2 + $0x58] sm:$0x3] %vm1228_vm4, %v4027_v61  ;;  %v1358_v8 = vshll.u32 %v5681_v2, 16  ;;  %v1354_v52 = vshrl.u32 %v5629_v22, 16  ;;  %v2226_v37 = vrot.slane %v2224_v60, 1 }
 0x14f   : > { %4421 = vmatprep.mubr.msk.bf16.mxu0 %vm5092_vm5, %v6411_v62  ;;  %4454 = vmatpush3.bf16.msra.mxu0 %v5000_v48  ;;  %1226 = vst.msk [vmem:[#allocation2 + $0x50] sm:$0xf] %vm1205_vm6, %v4025_v13  ;;  %v1353_v63 = vsel %vm1317_vm7, %v1348_v39, %v1352_v43  ;;  %v2222_v56 = vsel %vm2187_vm9, %v2212_v33, %v2221_v26  ;;  %v2229_v46 = vrot.slane %v2227_v31, 2  ;;  %v1366_v10 = vshll.u32 %v5690_v41, 16 }
 0x150   : > { %v4026_v0 = vpack.c.bf16 %v1110_v53, %v1110_v53  ;;  %4455 = vmatprep.subr.bf16.mxu0 %v6411_v62  ;;  %v1356_v6 = vor.u32 %v1354_v52, %v1352_v43  ;;  %v2233_v44 = vshrl.u32 %v5694_v12, 16  ;;  %v1360_v15 = vrot.slane %v1358_v8, 1  ;;  %v5714_v11 = vld [vmem:[#allocation2 + $0x40] sm:$0xff]  }
 0x151   : > { %v2236_v25 = vshll.u32 %v5694_v12, 16  ;;  %v2242_v1 = vshrl.u32 %v5701_v28, 16  ;;  %v3914_v57 = vcombine.low %v2451_v38, %v5513_v3  ;;  %v2230_v21 = vor.u32 %v2229_v46, %v2226_v37  ;;  %v5718_v7 = vld [vmem:[#allocation2 + $0x40] sm:$0xff]   ;;  %v5725_v3 = vld [vmem:[#allocation2 + $0x48] sm:$0xff]  }
 0x152   : > { %1227 = vst.msk [vmem:[#allocation2 + $0x54] sm:$0xf] %vm1205_vm6, %v4026_v0  ;;  %4250 = vmatmul.mubr.msk.bf16.gmra.mrb[52].mxu1 %vm1418_vm8, %v1353_v63  ;;  %v1362_v36 = vshrl.u32 %v5681_v2, 16  ;;  %v1368_v51 = vrot.slane %v1366_v10, 1  ;;  %v1361_v9 = vsel %vm1317_vm7, %v1356_v6, %v1360_v15  ;;  %v2235_v30 = vrot.slane %v2233_v44, 1 }
 0x153   : > { %4456 = vmatpush3.bf16.msra.mxu0 %v5007_v29  ;;  %4253 = vmatprep.mubr.msk.bf16.mxu1 %vm5092_vm5, %v6411_v62  ;;  %v1370_v27 = vshrl.u32 %v5690_v41, 16  ;;  %v2238_v42 = vrot.slane %v2236_v25, 2  ;;  %v1374_v54 = vshll.u32 %v5711_v4, 16  ;;  %v2245_v14 = vshll.u32 %v5701_v28, 16 }
 0x154   : > { %4493 = vmatprep.subr.bf16.mxu0 %v6411_v62  ;;  %v1364_v55 = vor.u32 %v1362_v36, %v1360_v15  ;;  %v2244_v34 = vrot.slane %v2242_v1, 1  ;;  %v1382_v45 = vshll.u32 %v5714_v11, 16  ;;  %v2465_v33 = vrot.slane %v3914_v57, 2  ;;  %v5008_v46 = vld [vmem:[#allocation2 + $0x48] ss:$0 sps:$4 sm:$0x11]  }
 0x155   : > { %v2466_v48 = vrot.slane %v5566_v19, 2  ;;  %v2231_v18 = vsel %vm2187_vm9, %v2221_v26, %v2230_v21  ;;  %v2251_v50 = vshrl.u32 %v5718_v7, 16  ;;  %v2254_v32 = vshll.u32 %v5718_v7, 16 }
 0x156   : > { %4422 = vmatmul.mubr.msk.bf16.gmra.mrb[16].mxu0 %vm1418_vm8, %v2222_v56  ;;  %v5012_v61 = vld [vmem:[#allocation2 + $0x50] ss:$0 sps:$4 sm:$0x33]   ;;  %v2468_v5 = vrot.slane %v5590_v24, 2  ;;  %v2470_v58 = vrot.slane %v5638_v47, 2  ;;  %v2472_v13 = vrot.slane %v5671_v35, 2  ;;  %v2239_v63 = vor.u32 %v2238_v42, %v2235_v30 }
 0x157   : > { %4425 = vmatprep.mubr.msk.bf16.mxu0 %vm5092_vm5, %v6411_v62  ;;  %v5737_v20 = vsel %vm503_vm2, %v2465_v33, %v2466_v48  ;;  %v2474_v53 = vrot.slane %v5694_v12, 2  ;;  %v2260_v17 = vshrl.u32 %v5725_v3, 16  ;;  %v2263_v43 = vshll.u32 %v5725_v3, 16 }
 0x158   : > { %v5747_v29 = vsel %vm503_vm2, %v2466_v48, %v2468_v5  ;;  %v2476_v0 = vrot.slane %v5701_v28, 2  ;;  %v5751_v39 = vsel %vm503_vm2, %v2468_v5, %v2470_v58  ;;  %v5754_v26 = vsel %vm503_vm2, %v2470_v58, %v2472_v13  ;;  %v5780_v48 = vld [vmem:[#allocation2 + $0x14] sm:$0xf]  ;;  %v5792_v58 = vld [vmem:[#allocation2 + $0x18] sm:$0xff]  }
 0x159   : > { %v5757_v60 = vsel %vm503_vm2, %v2472_v13, %v2474_v53  ;;  %v2478_v31 = vrot.slane %v5718_v7, 2  ;;  %v2247_v8 = vrot.slane %v2245_v14, 2  ;;  %v2480_v56 = vrot.slane %v5725_v3, 2 }
 0x15a   : > { %4254 = vmatmul.mubr.msk.bf16.gmra.mrb[56].mxu1 %vm1418_vm8, %v1361_v9  ;;  %v5761_v52 = vsel %vm503_vm2, %v2474_v53, %v2476_v0  ;;  %v1369_v37 = vsel %vm1317_vm7, %v1364_v55, %v1368_v51  ;;  %v2482_v6 = vrot.slane %v5012_v61, 2  ;;  %v1372_v44 = vor.u32 %v1370_v27, %v1368_v51 }
 0x15b   : > { %4257 = vmatprep.mubr.msk.bf16.mxu1 %vm5092_vm5, %v6411_v62  ;;  %v5766_v10 = vsel %vm503_vm2, %v2476_v0, %v2478_v31  ;;  %v2253_v38 = vrot.slane %v2251_v50, 1  ;;  %v2256_v15 = vrot.slane %v2254_v32, 2  ;;  %v5770_v25 = vsel %vm503_vm2, %v2478_v31, %v2480_v56 }
 0x15c   : > { %v1384_v1 = vrot.slane %v1382_v45, 1  ;;  %v2262_v57 = vrot.slane %v2260_v17, 1  ;;  %v2265_v36 = vrot.slane %v2263_v43, 2  ;;  %v5775_v9 = vsel %vm503_vm2, %v2480_v56, %v2482_v6 }
 0x15d   : > { %v2240_v30 = vsel %vm2187_vm9, %v2230_v21, %v2239_v63  ;;  %v1376_v55 = vrot.slane %v1374_v54, 1  ;;  %v2248_v42 = vor.u32 %v2247_v8, %v2244_v34  ;;  %v1386_v51 = vshrl.u32 %v5714_v11, 16  ;;  %v2658_v34 = vld [vmem:[#allocation2 + $0x10] sm:$0xc]  ;;  %v5802_v8 = vld [vmem:[#allocation2 + $0x20] sm:$0xff]  }
 0x15e   : > { %4426 = vmatmul.mubr.msk.bf16.gmra.mrb[20].mxu0 %vm1418_vm8, %v2231_v18  ;;  %v1390_v27 = vshll.u32 %v5008_v46, 16  ;;  %v2269_v14 = vshrl.u32 %v5012_v61, 16  ;;  %v2272_v33 = vshll.u32 %v5012_v61, 16  ;;  %v1378_v45 = vshrl.u32 %v5711_v4, 16 }
 0x15f   : > { %4429 = vmatprep.mubr.msk.bf16.mxu0 %vm5092_vm5, %v6411_v62  ;;  %v2257_v18 = vor.u32 %v2256_v15, %v2253_v38  ;;  %v1377_v50 = vsel %vm1317_vm7, %v1372_v44, %v1376_v55  ;;  %v1388_v21 = vor.u32 %v1386_v51, %v1384_v1  ;;  %v5786_v54 = vor.u32 %v2265_v36, %v2262_v57 }
 0x160   : > { %v2249_v32 = vsel %vm2187_vm9, %v2239_v63, %v2248_v42  ;;  %v1380_v5 = vor.u32 %v1378_v45, %v1376_v55  ;;  %v5790_v61 = vcombine.low %v2658_v34, %v5780_v48  ;;  %v6406_v13 = vrot.slane %v5714_v11, 1  ;;  %v5847_v34 = vld [vmem:[#allocation2 + $0x38] sm:$0xff]  }
 0x161   : > { %v1392_v53 = vrot.slane %v1390_v27, 1  ;;  %v5795_v17 = vrot.slane %v2269_v14, 1  ;;  %v5797_v43 = vrot.slane %v2272_v33, 2  ;;  %v1729_v0 = vrot.slane %v5008_v46, 1 }
 0x162   : > { %4258 = vmatmul.mubr.msk.bf16.gmra.mrb[60].mxu1 %vm1418_vm8, %v1369_v37  ;;  %v1385_v31 = vsel %vm1317_vm7, %v1380_v5, %v1384_v1  ;;  %v2258_v63 = vsel %vm2187_vm9, %v2248_v42, %v2257_v18  ;;  %v1981_v56 = vrot.slane %v5520_v49, 1  ;;  %v1982_v37 = vrot.slane %v5566_v19, 1  ;;  %v5821_v49 = vld [vmem:[#allocation2 + $0x28] sm:$0xff]   ;;  %v5839_v42 = vld [vmem:[#allocation2 + $0x30] sm:$0xff]  }
 0x163   : > { %4261 = vmatprep.mubr.msk.bf16.mxu1 %vm5092_vm5, %v6411_v62  ;;  %v5809_v6 = vsel %vm1317_vm7, %v1388_v21, %v1392_v53  ;;  %v5813_v46 = vsel %vm2187_vm9, %v2257_v18, %v5786_v54  ;;  %v5818_v44 = vsel %vm1711_vm10, %v6406_v13, %v1729_v0  ;;  %v1984_v38 = vrot.slane %v5590_v24, 1 }
 0x164   : > { %v5824_v19 = vsel %vm1711_vm10, %v1981_v56, %v1982_v37  ;;  %v2942_v15 = vshrl.u32 %v5790_v61, 16  ;;  %v2945_v1 = vshll.u32 %v5790_v61, 16  ;;  %v2950_v57 = vshrl.u32 %v5792_v58, 16 }
 0x165   : > { %v2953_v24 = vshll.u32 %v5792_v58, 16  ;;  %v1986_v55 = vrot.slane %v5638_v47, 1  ;;  %v2959_v33 = vshrl.u32 %v5802_v8, 16  ;;  %v1988_v21 = vrot.slane %v5671_v35, 1 }
 0x166   : > { %4430 = vmatmul.mubr.msk.bf16.gmra.mrb[24].mxu0 %vm1418_vm8, %v2240_v30  ;;  %v5833_v30 = vsel %vm1711_vm10, %v1982_v37, %v1984_v38  ;;  %v2944_v51 = vrot.slane %v2942_v15, 2  ;;  %v2947_v27 = vrot.slane %v2945_v1, 3  ;;  %v2952_v14 = vrot.slane %v2950_v57, 2  ;;  %v5856_v15 = vld [vmem:[#allocation2 + $0x40] sm:$0xff]  }
 0x167   : > { %4433 = vmatprep.mubr.msk.bf16.mxu0 %vm5092_vm5, %v6411_v62  ;;  %v2955_v45 = vrot.slane %v2953_v24, 3  ;;  %v5843_v18 = vsel %vm1711_vm10, %v1984_v38, %v1986_v55  ;;  %v2968_v5 = vshrl.u32 %v5821_v49, 16  ;;  %v2971_v53 = vshll.u32 %v5821_v49, 16 }
 0x168   : > { %v2948_v47 = vor.u32 %v2947_v27, %v2944_v51  ;;  %v5852_v37 = vsel %vm1711_vm10, %v1986_v55, %v1988_v21  ;;  %v1990_v38 = vrot.slane %v5694_v12, 1  ;;  %v2977_v57 = vshrl.u32 %v5839_v42, 16 }
 0x169   : > { %v2956_v0 = vor.u32 %v2955_v45, %v2952_v14  ;;  %v2970_v35 = vrot.slane %v2968_v5, 2  ;;  %v2973_v1 = vrot.slane %v2971_v53, 3  ;;  %v2980_v24 = vshll.u32 %v5839_v42, 16  ;;  %v5883_v53 = vld [vmem:[#allocation2 + $0x50] sm:$0xff]  }
 0x16a   : > { %4262 = vmatmul.mubr.msk.bf16.gmra.mrb[64].mxu1 %vm1418_vm8, %v1377_v50  ;;  %v2962_v50 = vshll.u32 %v5802_v8, 16  ;;  %v5866_v27 = vsel %vm1711_vm10, %v1988_v21, %v1990_v38  ;;  %v1992_v12 = vrot.slane %v5701_v28, 1  ;;  %v2989_v21 = vshll.u32 %v5847_v34, 16  ;;  %v5043_v28 = vld [vmem:[#allocation2 + $0x50] ss:$0 sps:$4 sm:$0x11]  }
 0x16b   : > { %4265 = vmatprep.mubr.msk.bf16.mxu1 %vm5092_vm5, %v6411_v62  ;;  %v5863_v51 = vsel %vm2940_vm11, %v2948_v47, %v2956_v0  ;;  %v2974_v14 = vor.u32 %v2973_v1, %v2970_v35  ;;  %v2982_v45 = vrot.slane %v2980_v24, 3  ;;  %v5894_v24 = vld [vmem:[#allocation2 + $0x58] ss:$0 sps:$4 sm:$0x77]  }
 0x16c   : > { %v2964_v56 = vrot.slane %v2962_v50, 3  ;;  %v2986_v50 = vshrl.u32 %v5847_v34, 16  ;;  %v5877_v47 = vsel %vm1711_vm10, %v1990_v38, %v1992_v12  ;;  %v2991_v1 = vrot.slane %v2989_v21, 3 }
 0x16d   : > { %6412 = vst [vmem:[#allocation4_spill] sm:$0xff] %v5877_v47  ;;  %v3013_v47 = vshrl.u32 %v5883_v53, 16 }
 0x16e   : > { %4434 = vmatmul.mubr.msk.bf16.gmra.mrb[28].mxu0 %vm1418_vm8, %v2249_v32  ;;  %v2961_v32 = vrot.slane %v2959_v33, 2  ;;  %v2979_v33 = vrot.slane %v2977_v57, 2  ;;  %v2988_v35 = vrot.slane %v2986_v50, 2  ;;  %v2998_v57 = vshll.u32 %v5856_v15, 16 }
 0x16f   : > { %4437 = vmatprep.mubr.msk.bf16.mxu0 %vm5092_vm5, %v6411_v62 }
 0x170   : > { %v2965_v55 = vor.u32 %v2964_v56, %v2961_v32  ;;  %v1994_v32 = vrot.slane %v5718_v7, 1  ;;  %v1996_v7 = vrot.slane %v5725_v3, 1  ;;  %v3000_v50 = vrot.slane %v2998_v57, 3 }
 0x172   : > { %4266 = vmatmul.mubr.msk.bf16.gmra.mrb[68].mxu1 %vm1418_vm8, %v1385_v31  ;;  %v5869_v31 = vld [vmem:[#allocation2 + $0x48] sm:$0xff]   ;;  %v5874_v5 = vsel %vm2940_vm11, %v2956_v0, %v2965_v55  ;;  %v5886_v56 = vsel %vm2940_vm11, %v2965_v55, %v2974_v14  ;;  %v2995_v0 = vshrl.u32 %v5856_v15, 16  ;;  %v5890_v38 = vsel %vm1711_vm10, %v1992_v12, %v1994_v32 }
 0x173   : > { %4269 = vmatprep.mubr.msk.bf16.mxu1 %vm5092_vm5, %v6411_v62  ;;  %6413 = vst [vmem:[#allocation5_spill] sm:$0xff] %v5890_v38  ;;  %v3004_v55 = vshrl.u32 %v5869_v31, 16  ;;  %v5902_v21 = vsel %vm1711_vm10, %v1994_v32, %v1996_v7  ;;  %v1998_v12 = vrot.slane %v5043_v28, 1  ;;  %v3022_v28 = vshrl.u32 %v5894_v24, 16 }
 0x174   : > { %v2997_v36 = vrot.slane %v2995_v0, 2  ;;  %6414 = vst [vmem:[#allocation6_spill] sm:$0xff] %v5902_v21 }
 0x175   : > { %v3006_v3 = vrot.slane %v3004_v55, 2  ;;  %v5914_v32 = vsel %vm1711_vm10, %v1996_v7, %v1998_v12  ;;  %v3025_v55 = vshll.u32 %v5894_v24, 16  ;;  %v3219_v7 = vrot.slane %v5792_v58, 3 }
 0x176   : > { %4438 = vmatmul.mubr.msk.bf16.gmra.mrb[32].mxu0 %vm1418_vm8, %v2258_v63  ;;  %v2983_v63 = vor.u32 %v2982_v45, %v2979_v33  ;;  %v3007_v33 = vshll.u32 %v5869_v31, 16  ;;  %v2992_v45 = vor.u32 %v2991_v1, %v2988_v35  ;;  %v3001_v35 = vor.u32 %v3000_v50, %v2997_v36  ;;  %6415 = vst [vmem:[#allocation7_spill] sm:$0xff] %v5914_v32 }
 0x177   : > { %4441 = vmatprep.mubr.msk.bf16.mxu0 %vm5092_vm5, %v6411_v62  ;;  %v3027_v50 = vrot.slane %v3025_v55, 3  ;;  %v3221_v12 = vrot.slane %v5802_v8, 3 }
 0x178   : > { %v5897_v13 = vsel %vm2940_vm11, %v2974_v14, %v2983_v63  ;;  %v3009_v38 = vrot.slane %v3007_v33, 3  ;;  %v3016_v14 = vshll.u32 %v5883_v53, 16  ;;  %v5911_v0 = vsel %vm2940_vm11, %v2983_v63, %v2992_v45  ;;  %v3204_v33 = vld [vmem:[#allocation2 + $0x10] sm:$0x8] }
 0x179   : > { %v5921_v21 = vsel %vm2940_vm11, %v2992_v45, %v3001_v35  ;;  %v3024_v63 = vrot.slane %v3022_v28, 2  ;;  %v3989_v36 = vcombine.low %v3204_v33, %v5780_v48  ;;  %v3225_v48 = vrot.slane %v5839_v42, 3 }
 0x17a   : > { %4270 = vmatmul.mubr.msk.bf16.gmra.mrb[72].mxu1 %vm1418_vm8, %v5809_v6  ;;  %v3010_v1 = vor.u32 %v3009_v38, %v3006_v3  ;;  %v3015_v6 = vrot.slane %v3013_v47, 2  ;;  %v3018_v57 = vrot.slane %v3016_v14, 3  ;;  %v3223_v3 = vrot.slane %v5821_v49, 3 }
 0x17b   : > { %4281 = vmatprep.mubr.msk.bf16.mxu1 %vm5092_vm5, %v6411_v62  ;;  %v3218_v45 = vrot.slane %v3989_v36, 3  ;;  %v3227_v14 = vrot.slane %v5847_v34, 3 }
 0x17c   : > { %v5928_v47 = vsel %vm2940_vm11, %v3001_v35, %v3010_v1  ;;  %v3019_v38 = vor.u32 %v3018_v57, %v3015_v6  ;;  %v3028_v35 = vor.u32 %v3027_v50, %v3024_v63  ;;  %v5941_v6 = vsel %vm502_vm1, %v3219_v7, %v3221_v12 }
 0x17d   : > { %v3229_v57 = vrot.slane %v5856_v15, 3  ;;  %v5945_v55 = vsel %vm502_vm1, %v3218_v45, %v3219_v7  ;;  %v5948_v33 = vsel %vm502_vm1, %v3221_v12, %v3223_v3  ;;  %v5951_v36 = vsel %vm502_vm1, %v3223_v3, %v3225_v48  ;;  %v5017_v12 = vld [vmem:[%s6400_s4 + $0x48] sm:$0xff]  }
 0x17e   : > { %4442 = vmatmul.mubr.msk.bf16.gmra.mrb[36].mxu0 %vm1418_vm8, %v5813_v46  ;;  %v5016_v46 = vld [vmem:[%s6400_s4 + $0x40] sm:$0xff]   ;;  %v5938_v28 = vsel %vm2940_vm11, %v3010_v1, %v3019_v38  ;;  %v5954_v32 = vsel %vm502_vm1, %v3225_v48, %v3227_v14  ;;  %v5959_v1 = vsel %vm2940_vm11, %v3019_v38, %v3028_v35  ;;  %v3231_v7 = vrot.slane %v5869_v31, 3 }
 0x17f   : > { %4445 = vmatprep.mubr.msk.bf16.mxu0 %vm5092_vm5, %v6411_v62  ;;  %v5962_v63 = vsel %vm502_vm1, %v3227_v14, %v3229_v57  ;;  %v3233_v50 = vrot.slane %v5883_v53, 3  ;;  %v6416_v38 = vor.u32 %v5797_v43, %v5795_v17  ;;  %v5013_v17 = vld [vmem:[%s6400_s4 + $0xc0] sm:$0xff]   ;;  %v5020_v43 = vld [vmem:[%s6400_s4 + $0x58] sm:$0xff]  }
 0x180   : > { %v5979_v3 = vsel %vm502_vm1, %v3229_v57, %v3231_v7  ;;  %v5032_v14 = vld [vmem:[%s6400_s4 + $0x60] sm:$0xff]   ;;  %v1715_v57 = vrot.slane %v5560_v59, 1 }
 0x181   : > { %v2276_v45 = vsel %vm2187_vm9, %v5786_v54, %v6416_v38  ;;  %v5982_v48 = vsel %vm502_vm1, %v3231_v7, %v3233_v50  ;;  %v5019_v54 = vld [vmem:[%s6400_s4 + $0x50] sm:$0xff]   ;;  %v5026_v38 = vld [vmem:[%s6400_s4 + $0xe8] sm:$0xff]  }
 0x182   : > { %4282 = vmatmul.mubr.msk.bf16.vlgmr.msra.gmra.mrb[40].mxu1 %vm1418_vm8, %v5525_v40  ;;  %v3235_v40 = vrot.slane %v5894_v24, 3  ;;  %v5018_v24 = vld [vmem:[%s6400_s4 + $0xd8] sm:$0xff]   ;;  %v5036_v7 = vld [vmem:[%s6400_s4 + $0x70] sm:$0xff]  }
 0x183   : > { %4285 = vmatprep.mubr.msk.bf16.mxu1 %vm5092_vm5, %v6411_v62  ;;  %4318 = vmatpush3.bf16.msra.mxu1 %v5016_v46 }
 0x184   : > { %4319 = vmatprep.subr.bf16.mxu1 %v6411_v62  ;;  %v5986_v46 = vsel %vm502_vm1, %v3233_v50, %v3235_v40  ;;  %v2734_v50 = vrot.slane %v5790_v61, 2  ;;  %v5037_v61 = vld [vmem:[%s6400_s4 + $0x78] sm:$0xff]  }
 0x186   : > { %4446 = vmatmul.mubr.msk.bf16.gmra.mrb[40].mxu0 %vm1418_vm8, %v2276_v45  ;;  %v2737_v45 = vrot.slane %v5802_v8, 2  ;;  %v1719_v8 = vrot.slane %v5629_v22, 1 }
 0x187   : > { %4457 = vmatprep.mubr.msk.bf16.mxu0 %vm5092_vm5, %v6411_v62  ;;  %4320 = vmatpush3.bf16.msra.mxu1 %v5017_v12 }
 0x188   : > { %4321 = vmatprep.subr.bf16.mxu1 %v6411_v62 }
 0x18a   : > { %4286 = vmatmul.mubr.msk.bf16.gmra.mrb[44].mxu1 %vm1418_vm8, %v5511_v16  ;;  %v5014_v16 = vld [vmem:[%s6400_s4 + $0xc8] sm:$0xff]  }
 0x18b   : > { %4289 = vmatprep.mubr.msk.bf16.mxu1 %vm5092_vm5, %v6411_v62  ;;  %4322 = vmatpush3.bf16.msra.mxu1 %v5019_v54 }
 0x18c   : > { %4323 = vmatprep.subr.bf16.mxu1 %v6411_v62 }
 0x18e   : > { %4458 = vmatmul.mubr.msk.bf16.vlgmr.msra.gmra.mrb[8].mxu0 %vm1418_vm8, %v5737_v20  ;;  %v5015_v20 = vld [vmem:[%s6400_s4 + $0xd0] sm:$0xff]  }
 0x18f   : > { %4494 = vmatpush3.bf16.msra.mxu0 %v5013_v17  ;;  %4461 = vmatprep.mubr.msk.bf16.mxu0 %vm5092_vm5, %v6411_v62 }
 0x190   : > { %4495 = vmatprep.subr.bf16.mxu0 %v6411_v62  ;;  %4324 = vmatpush3.bf16.msra.mxu1 %v5020_v43  ;;  %v5034_v43 = vld [vmem:[%s6400_s4 + $0xf8] sm:$0xff]  }
 0x191   : > { %4361 = vmatprep.subr.bf16.mxu1 %v6411_v62 }
 0x192   : > { %4290 = vmatmul.mubr.msk.bf16.gmra.mrb[48].mxu1 %vm1418_vm8, %v5560_v59  ;;  %v5023_v59 = vld [vmem:[%s6400_s4 + $0xe0] sm:$0xff]  }
 0x193   : > { %4496 = vmatpush3.bf16.msra.mxu0 %v5014_v16  ;;  %4293 = vmatprep.mubr.msk.bf16.mxu1 %vm5092_vm5, %v6411_v62  ;;  %v2739_v16 = vrot.slane %v5821_v49, 2  ;;  %v2741_v49 = vrot.slane %v5839_v42, 2 }
 0x194   : > { %4497 = vmatprep.subr.bf16.mxu0 %v6411_v62 }
 0x196   : > { %4462 = vmatmul.mubr.msk.bf16.gmra.mrb[12].mxu0 %vm1418_vm8, %v5747_v29  ;;  %v1698_v29 = vld [vmem:[#allocation2] sm:$0xe] }
 0x197   : > { %4465 = vmatprep.mubr.msk.bf16.mxu0 %vm5092_vm5, %v6411_v62  ;;  %4498 = vmatpush3.bf16.msra.mxu0 %v5015_v20 }
 0x198   : > { %4499 = vmatprep.subr.bf16.mxu0 %v6411_v62 }
 0x19a   : > { %4294 = vmatmul.mubr.msk.bf16.gmra.mrb[52].mxu1 %vm1418_vm8, %v5588_v23 }
 0x19b   : > { %4500 = vmatpush3.bf16.msra.mxu0 %v5018_v24  ;;  %4297 = vmatprep.mubr.msk.bf16.mxu1 %vm5092_vm5, %v6411_v62  ;;  %v1721_v24 = vrot.slane %v5681_v2, 1 }
 0x19c   : > { %4537 = vmatprep.subr.bf16.mxu0 %v6411_v62 }
 0x19e   : > { %4466 = vmatmul.mubr.msk.bf16.gmra.mrb[16].mxu0 %vm1418_vm8, %v5751_v39  ;;  %v5046_v39 = vld [vmem:[#allocation2 + $0x4] sm:$0xf] }
 0x19f   : > { %4469 = vmatprep.mubr.msk.bf16.mxu0 %vm5092_vm5, %v6411_v62 }
 0x1a2   : > { %4298 = vmatmul.mubr.msk.bf16.gmra.mrb[56].mxu1 %vm1418_vm8, %v5629_v22  ;;  %v2740_v22 = vsel %vm503_vm2, %v2737_v45, %v2739_v16 }
 0x1a3   : > { %4301 = vmatprep.mubr.msk.bf16.mxu1 %vm5092_vm5, %v6411_v62 }
 0x1a6   : > { %4470 = vmatmul.mubr.msk.bf16.gmra.mrb[20].mxu0 %vm1418_vm8, %v5754_v26  ;;  %v3839_v26 = vcombine.low %v1698_v29, %v5046_v39  ;;  %v1722_v29 = vsel %vm1711_vm10, %v1719_v8, %v1721_v24  ;;  %v2742_v39 = vsel %vm503_vm2, %v2739_v16, %v2741_v49 }
 0x1a7   : > { %4473 = vmatprep.mubr.msk.bf16.mxu0 %vm5092_vm5, %v6411_v62 }
 0x1aa   : > { %4302 = vmatmul.mubr.msk.bf16.gmra.mrb[60].mxu1 %vm1418_vm8, %v5681_v2  ;;  %v2743_v2 = vrot.slane %v5847_v34, 2 }
 0x1ab   : > { %4305 = vmatprep.mubr.msk.bf16.mxu1 %vm5092_vm5, %v6411_v62 }
 0x1ae   : > { %4474 = vmatmul.mubr.msk.bf16.gmra.mrb[24].mxu0 %vm1418_vm8, %v5757_v60  ;;  %v1712_v60 = vrot.slane %v3839_v26, 1  ;;  %v1723_v26 = vrot.slane %v5690_v41, 1 }
 0x1af   : > { %4477 = vmatprep.mubr.msk.bf16.mxu0 %vm5092_vm5, %v6411_v62 }
 0x1b0   : > { %v1724_v42 = vsel %vm1711_vm10, %v1721_v24, %v1723_v26 }
 0x1b2   : > { %4306 = vmatmul.mubr.msk.bf16.gmra.mrb[64].mxu1 %vm1418_vm8, %v5690_v41  ;;  %v2745_v41 = vrot.slane %v5856_v15, 2 }
 0x1b3   : > { %4309 = vmatprep.mubr.msk.bf16.mxu1 %vm5092_vm5, %v6411_v62 }
 0x1b6   : > { %4478 = vmatmul.mubr.msk.bf16.gmra.mrb[28].mxu0 %vm1418_vm8, %v5761_v52  ;;  %v5047_v52 = vld [vmem:[#allocation2 + $0x8] sm:$0xff]  }
 0x1b7   : > { %4481 = vmatprep.mubr.msk.bf16.mxu0 %vm5092_vm5, %v6411_v62 }
 0x1ba   : > { %4310 = vmatmul.mubr.msk.bf16.gmra.mrb[68].mxu1 %vm1418_vm8, %v5711_v4 }
 0x1bb   : > { %4313 = vmatprep.mubr.msk.bf16.mxu1 %vm5092_vm5, %v6411_v62 }
 0x1be   : > { %4482 = vmatmul.mubr.msk.bf16.gmra.mrb[32].mxu0 %vm1418_vm8, %v5766_v10  ;;  %v1713_v10 = vrot.slane %v5047_v52, 1  ;;  %v1725_v52 = vrot.slane %v5711_v4, 1  ;;  %v2747_v4 = vrot.slane %v5869_v31, 2  ;;  %v5038_v31 = vld [vmem:[#allocation2 + $0x58] ss:$0 sps:$4 sm:$0x33]  }
 0x1bf   : > { %4485 = vmatprep.mubr.msk.bf16.mxu0 %vm5092_vm5, %v6411_v62 }
 0x1c0   : > { %v1714_v35 = vsel %vm1711_vm10, %v1712_v60, %v1713_v10  ;;  %v1716_v12 = vsel %vm1711_vm10, %v1713_v10, %v1715_v57  ;;  %v2744_v60 = vsel %vm503_vm2, %v2741_v49, %v2743_v2  ;;  %v1726_v34 = vsel %vm1711_vm10, %v1723_v26, %v1725_v52  ;;  %v3432_v26 = vpop.permute.xlu1 %3431 }
 0x1c1   : > { %v2746_v10 = vsel %vm503_vm2, %v2743_v2, %v2745_v41 }
 0x1c2   : > { %4314 = vmatmul.mubr.msk.bf16.gmra.mrb[72].mxu1 %vm1418_vm8, %v5714_v11 }
 0x1c3   : > { %4325 = vmatprep.mubr.msk.bf16.mxu1 %vm5092_vm5, %v6411_v62 }
 0x1c6   : > { %4486 = vmatmul.mubr.msk.bf16.gmra.mrb[36].mxu0 %vm1418_vm8, %v5770_v25  ;;  %v5033_v25 = vld [vmem:[%s6400_s4 + $0x68] sm:$0xff]  }
 0x1c7   : > { %4489 = vmatprep.mubr.msk.bf16.mxu0 %vm5092_vm5, %v6411_v62 }
 0x1ca   : > { %4326 = vmatmul.mubr.msk.bf16.vlgmr.msra.gmra.mrb[40].mxu1 %vm1418_vm8, %v1714_v35  ;;  %v2748_v35 = vsel %vm503_vm2, %v2745_v41, %v2747_v4  ;;  %v3437_v41 = vpop.permute.xlu0 %3436 }
 0x1cb   : > { %4329 = vmatprep.mubr.msk.bf16.mxu1 %vm5092_vm5, %v6411_v62  ;;  %4362 = vmatpush3.bf16.msra.mxu1 %v5032_v14  ;;  %v6417_v14 = vrot.slane %v5714_v11, 1 }
 0x1cc   : > { %4363 = vmatprep.subr.bf16.mxu1 %v6411_v62 }
 0x1cd   : > { %v1728_v15 = vsel %vm1711_vm10, %v1725_v52, %v6417_v14 }
 0x1ce   : > { %4490 = vmatmul.mubr.msk.bf16.gmra.mrb[40].mxu0 %vm1418_vm8, %v5775_v9  ;;  %v2735_v9 = vrot.slane %v5792_v58, 2  ;;  %v1717_v58 = vrot.slane %v5588_v23, 1  ;;  %v5029_v23 = vld [vmem:[%s6400_s4 + $0xf0] sm:$0xff]  }
 0x1cf   : > { %4501 = vmatprep.mubr.msk.bf16.mxu0 %vm5092_vm5, %v6411_v62  ;;  %4364 = vmatpush3.bf16.msra.mxu1 %v5033_v25  ;;  %v2749_v25 = vrot.slane %v5883_v53, 2  ;;  %v5039_v53 = vld [vmem:[%s6400_s4 + $0x100] sm:$0xff]  }
 0x1d0   : > { %4365 = vmatprep.subr.bf16.mxu1 %v6411_v62  ;;  %v2736_v40 = vsel %vm503_vm2, %v2734_v50, %v2735_v9  ;;  %v1718_v54 = vsel %vm1711_vm10, %v1715_v57, %v1717_v58  ;;  %v2738_v17 = vsel %vm503_vm2, %v2735_v9, %v2737_v45  ;;  %v1720_v20 = vsel %vm1711_vm10, %v1717_v58, %v1719_v8 }
 0x1d1   : > { %v2750_v11 = vsel %vm503_vm2, %v2747_v4, %v2749_v25  ;;  %v2751_v57 = vrot.slane %v5038_v31, 2  ;;  %v3442_v31 = vpop.permute.xlu1 %3441 }
 0x1d2   : > { %4330 = vmatmul.mubr.msk.bf16.gmra.mrb[44].mxu1 %vm1418_vm8, %v1716_v12 }
 0x1d3   : > { %4333 = vmatprep.mubr.msk.bf16.mxu1 %vm5092_vm5, %v6411_v62  ;;  %4366 = vmatpush3.bf16.msra.mxu1 %v5036_v7 }
 0x1d4   : > { %4367 = vmatprep.subr.bf16.mxu1 %v6411_v62 }
 0x1d6   : > { %4502 = vmatmul.mubr.msk.bf16.vlgmr.msra.gmra.mrb[8].mxu0 %vm1418_vm8, %v2736_v40 }
 0x1d7   : > { %4538 = vmatpush3.bf16.msra.mxu0 %v5023_v59  ;;  %4505 = vmatprep.mubr.msk.bf16.mxu0 %vm5092_vm5, %v6411_v62 }
 0x1d8   : > { %4539 = vmatprep.subr.bf16.mxu0 %v6411_v62  ;;  %4368 = vmatpush3.bf16.msra.mxu1 %v5037_v61 }
 0x1da   : > { %4334 = vmatmul.mubr.msk.bf16.gmra.mrb[48].mxu1 %vm1418_vm8, %v1718_v54 }
 0x1db   : > { %4540 = vmatpush3.bf16.msra.mxu0 %v5026_v38  ;;  %4337 = vmatprep.mubr.msk.bf16.mxu1 %vm5092_vm5, %v6411_v62 }
 0x1dc   : > { %4541 = vmatprep.subr.bf16.mxu0 %v6411_v62 }
 0x1de   : > { %4506 = vmatmul.mubr.msk.bf16.gmra.mrb[12].mxu0 %vm1418_vm8, %v2738_v17 }
 0x1df   : > { %4509 = vmatprep.mubr.msk.bf16.mxu0 %vm5092_vm5, %v6411_v62  ;;  %4542 = vmatpush3.bf16.msra.mxu0 %v5029_v23 }
 0x1e0   : > { %4543 = vmatprep.subr.bf16.mxu0 %v6411_v62 }
 0x1e2   : > { %4338 = vmatmul.mubr.msk.bf16.gmra.mrb[52].mxu1 %vm1418_vm8, %v1720_v20 }
 0x1e3   : > { %4544 = vmatpush3.bf16.msra.mxu0 %v5034_v43  ;;  %4341 = vmatprep.mubr.msk.bf16.mxu1 %vm5092_vm5, %v6411_v62 }
 0x1e4   : > { %4581 = vmatprep.subr.bf16.mxu0 %v6411_v62 }
 0x1e6   : > { %4510 = vmatmul.mubr.msk.bf16.gmra.mrb[16].mxu0 %vm1418_vm8, %v2740_v22 }
 0x1e7   : > { %4513 = vmatprep.mubr.msk.bf16.mxu0 %vm5092_vm5, %v6411_v62 }
 0x1ea   : > { %4342 = vmatmul.mubr.msk.bf16.gmra.mrb[56].mxu1 %vm1418_vm8, %v1722_v29 }
 0x1eb   : > { %4345 = vmatprep.mubr.msk.bf16.mxu1 %vm5092_vm5, %v6411_v62 }
 0x1ee   : > { %4514 = vmatmul.mubr.msk.bf16.gmra.mrb[20].mxu0 %vm1418_vm8, %v2742_v39 }
 0x1ef   : > { %4517 = vmatprep.mubr.msk.bf16.mxu0 %vm5092_vm5, %v6411_v62 }
 0x1f2   : > { %4346 = vmatmul.mubr.msk.bf16.gmra.mrb[60].mxu1 %vm1418_vm8, %v1724_v42 }
 0x1f3   : > { %4349 = vmatprep.mubr.msk.bf16.mxu1 %vm5092_vm5, %v6411_v62 }
 0x1f6   : > { %4518 = vmatmul.mubr.msk.bf16.gmra.mrb[24].mxu0 %vm1418_vm8, %v2744_v60 }
 0x1f7   : > { %4521 = vmatprep.mubr.msk.bf16.mxu0 %vm5092_vm5, %v6411_v62 }
 0x1fa   : > { %4350 = vmatmul.mubr.msk.bf16.gmra.mrb[64].mxu1 %vm1418_vm8, %v1726_v34 }
 0x1fb   : > { %4353 = vmatprep.mubr.msk.bf16.mxu1 %vm5092_vm5, %v6411_v62 }
 0x1fe   : > { %4522 = vmatmul.mubr.msk.bf16.gmra.mrb[28].mxu0 %vm1418_vm8, %v2746_v10 }
 0x1ff   : > { %4525 = vmatprep.mubr.msk.bf16.mxu0 %vm5092_vm5, %v6411_v62 }
 0x202   : > { %4354 = vmatmul.mubr.msk.bf16.gmra.mrb[68].mxu1 %vm1418_vm8, %v1728_v15 }
 0x203   : > { %4357 = vmatprep.mubr.msk.bf16.mxu1 %vm5092_vm5, %v6411_v62 }
 0x206   : > { %4526 = vmatmul.mubr.msk.bf16.gmra.mrb[32].mxu0 %vm1418_vm8, %v2748_v35 }
 0x207   : > { %4529 = vmatprep.mubr.msk.bf16.mxu0 %vm5092_vm5, %v6411_v62 }
 0x20a   : > { %4358 = vmatmul.mubr.msk.bf16.gmra.mrb[72].mxu1 %vm1418_vm8, %v5818_v44  ;;  %v2752_v44 = vsel %vm503_vm2, %v2749_v25, %v2751_v57 }
 0x20b   : > { %4369 = vmatprep.mubr.msk.bf16.mxu1 %vm5092_vm5, %v6411_v62 }
 0x20e   : > { %4530 = vmatmul.mubr.msk.bf16.gmra.mrb[36].mxu0 %vm1418_vm8, %v2750_v11 }
 0x20f   : > { %4533 = vmatprep.mubr.msk.bf16.mxu0 %vm5092_vm5, %v6411_v62 }
 0x212   : > { %4370 = vmatmul.mubr.msk.bf16.vlgmr.msra.gmra.mrb[40].mxu1 %vm1418_vm8, %v5824_v19  ;;  %v5040_v19 = vld [vmem:[%s6400_s4 + $0x108] sm:$0xff]  }
 0x213   : > { %4373 = vmatprep.mubr.msk.bf16.mxu1 %vm5092_vm5, %v6411_v62 }
 0x216   : > { %4534 = vmatmul.mubr.msk.bf16.gmra.mrb[40].mxu0 %vm1418_vm8, %v2752_v44 }
 0x217   : > { %4545 = vmatprep.mubr.msk.bf16.mxu0 %vm5092_vm5, %v6411_v62 }
 0x21a   : > { %4374 = vmatmul.mubr.msk.bf16.gmra.mrb[44].mxu1 %vm1418_vm8, %v5833_v30  ;;  %v5041_v30 = vld [vmem:[%s6400_s4 + $0x110] sm:$0xff]  }
 0x21b   : > { %4377 = vmatprep.mubr.msk.bf16.mxu1 %vm5092_vm5, %v6411_v62 }
 0x21e   : > { %4546 = vmatmul.mubr.msk.bf16.vlgmr.msra.gmra.mrb[8].mxu0 %vm1418_vm8, %v5863_v51  ;;  %v6419_v51 = vld [vmem:[#allocation5_spill] sm:$0xff] }
 0x21f   : > { %4582 = vmatpush3.bf16.msra.mxu0 %v5039_v53  ;;  %4549 = vmatprep.mubr.msk.bf16.mxu0 %vm5092_vm5, %v6411_v62 }
 0x220   : > { %4583 = vmatprep.subr.bf16.mxu0 %v6411_v62 }
 0x222   : > { %4378 = vmatmul.mubr.msk.bf16.gmra.mrb[48].mxu1 %vm1418_vm8, %v5843_v18  ;;  %v5042_v18 = vld [vmem:[%s6400_s4 + $0x118] sm:$0xff]  }
 0x223   : > { %4584 = vmatpush3.bf16.msra.mxu0 %v5040_v19  ;;  %4381 = vmatprep.mubr.msk.bf16.mxu1 %vm5092_vm5, %v6411_v62 }
 0x224   : > { %4585 = vmatprep.subr.bf16.mxu0 %v6411_v62 }
 0x226   : > { %4550 = vmatmul.mubr.msk.bf16.gmra.mrb[12].mxu0 %vm1418_vm8, %v5874_v5 }
 0x227   : > { %4553 = vmatprep.mubr.msk.bf16.mxu0 %vm5092_vm5, %v6411_v62  ;;  %4586 = vmatpush3.bf16.msra.mxu0 %v5041_v30 }
 0x228   : > { %4587 = vmatprep.subr.bf16.mxu0 %v6411_v62 }
 0x22a   : > { %4382 = vmatmul.mubr.msk.bf16.gmra.mrb[52].mxu1 %vm1418_vm8, %v5852_v37  ;;  %v6418_v37 = vld [vmem:[#allocation4_spill] sm:$0xff] }
 0x22b   : > { %4588 = vmatpush3.bf16.msra.mxu0 %v5042_v18  ;;  %4385 = vmatprep.mubr.msk.bf16.mxu1 %vm5092_vm5, %v6411_v62  ;;  %v3447_v18 = vpop.permute.xlu0 %3446 }
 0x22e   : > { %4554 = vmatmul.mubr.msk.bf16.gmra.mrb[16].mxu0 %vm1418_vm8, %v5886_v56 }
 0x22f   : > { %4557 = vmatprep.mubr.msk.bf16.mxu0 %vm5092_vm5, %v6411_v62 }
 0x232   : > { %4386 = vmatmul.mubr.msk.bf16.gmra.mrb[56].mxu1 %vm1418_vm8, %v5866_v27  ;;  %v6421_v27 = vld [vmem:[#allocation7_spill] sm:$0xff] }
 0x233   : > { %4389 = vmatprep.mubr.msk.bf16.mxu1 %vm5092_vm5, %v6411_v62 }
 0x236   : > { %4558 = vmatmul.mubr.msk.bf16.gmra.mrb[20].mxu0 %vm1418_vm8, %v5897_v13  ;;  %v6420_v13 = vld [vmem:[#allocation6_spill] sm:$0xff] }
 0x237   : > { %4561 = vmatprep.mubr.msk.bf16.mxu0 %vm5092_vm5, %v6411_v62 }
 0x23a   : > { %4390 = vmatmul.mubr.msk.bf16.gmra.mrb[60].mxu1 %vm1418_vm8, %v6418_v37 }
 0x23b   : > { %4393 = vmatprep.mubr.msk.bf16.mxu1 %vm5092_vm5, %v6411_v62 }
 0x23e   : > { %4562 = vmatmul.mubr.msk.bf16.gmra.mrb[24].mxu0 %vm1418_vm8, %v5911_v0 }
 0x23f   : > { %4565 = vmatprep.mubr.msk.bf16.mxu0 %vm5092_vm5, %v6411_v62 }
 0x242   : > { %4394 = vmatmul.mubr.msk.bf16.gmra.mrb[64].mxu1 %vm1418_vm8, %v6419_v51 }
 0x243   : > { %4397 = vmatprep.mubr.msk.bf16.mxu1 %vm5092_vm5, %v6411_v62 }
 0x246   : > { %4566 = vmatmul.mubr.msk.bf16.gmra.mrb[28].mxu0 %vm1418_vm8, %v5921_v21 }
 0x247   : > { %4569 = vmatprep.mubr.msk.bf16.mxu0 %vm5092_vm5, %v6411_v62 }
 0x24a   : > { %4398 = vmatmul.mubr.msk.bf16.gmra.mrb[68].mxu1 %vm1418_vm8, %v6420_v13 }
 0x24b   : > { %4401 = vmatprep.mubr.msk.bf16.mxu1 %vm5092_vm5, %v6411_v62 }
 0x24e   : > { %4570 = vmatmul.mubr.msk.bf16.gmra.mrb[32].mxu0 %vm1418_vm8, %v5928_v47 }
 0x24f   : > { %4573 = vmatprep.mubr.msk.bf16.mxu0 %vm5092_vm5, %v6411_v62 }
 0x252   : > { %4402 = vmatmul.mubr.msk.bf16.gmra.mrb[72].mxu1 %vm1418_vm8, %v6421_v27 }
 0x256   : > { %4574 = vmatmul.mubr.msk.bf16.gmra.mrb[36].mxu0 %vm1418_vm8, %v5938_v28 }
 0x257   : > { %4577 = vmatprep.mubr.msk.bf16.mxu0 %vm5092_vm5, %v6411_v62 }
 0x25e   : > { %4578 = vmatmul.mubr.msk.bf16.gmra.mrb[40].mxu0 %vm1418_vm8, %v5959_v1 }
 0x25f   : > { %4589 = vmatprep.mubr.msk.bf16.mxu0 %vm5092_vm5, %v6411_v62 }
 0x266   : > { %4590 = vmatmul.mubr.msk.bf16.vlgmr.msra.gmra.mrb[8].mxu0 %vm1418_vm8, %v5945_v55 }
 0x267   : > { %4593 = vmatprep.mubr.msk.bf16.mxu0 %vm5092_vm5, %v6411_v62 }
 0x26e   : > { %4594 = vmatmul.mubr.msk.bf16.gmra.mrb[12].mxu0 %vm1418_vm8, %v5941_v6 }
 0x26f   : > { %4597 = vmatprep.mubr.msk.bf16.mxu0 %vm5092_vm5, %v6411_v62 }
 0x276   : > { %4598 = vmatmul.mubr.msk.bf16.gmra.mrb[16].mxu0 %vm1418_vm8, %v5948_v33 }
 0x277   : > { %4601 = vmatprep.mubr.msk.bf16.mxu0 %vm5092_vm5, %v6411_v62 }
 0x27e   : > { %4602 = vmatmul.mubr.msk.bf16.gmra.mrb[20].mxu0 %vm1418_vm8, %v5951_v36 }
 0x27f   : > { %4605 = vmatprep.mubr.msk.bf16.mxu0 %vm5092_vm5, %v6411_v62 }
 0x286   : > { %4606 = vmatmul.mubr.msk.bf16.gmra.mrb[24].mxu0 %vm1418_vm8, %v5954_v32 }
 0x287   : > { %4609 = vmatprep.mubr.msk.bf16.mxu0 %vm5092_vm5, %v6411_v62 }
 0x28e   : > { %4610 = vmatmul.mubr.msk.bf16.gmra.mrb[28].mxu0 %vm1418_vm8, %v5962_v63 }
 0x28f   : > { %4613 = vmatprep.mubr.msk.bf16.mxu0 %vm5092_vm5, %v6411_v62 }
 0x296   : > { %4614 = vmatmul.mubr.msk.bf16.gmra.mrb[32].mxu0 %vm1418_vm8, %v5979_v3 }
 0x297   : > { %4617 = vmatprep.mubr.msk.bf16.mxu0 %vm5092_vm5, %v6411_v62 }
 0x29e   : > { %4618 = vmatmul.mubr.msk.bf16.gmra.mrb[36].mxu0 %vm1418_vm8, %v5982_v48 }
 0x29f   : > { %4621 = vmatprep.mubr.msk.bf16.mxu0 %vm5092_vm5, %v6411_v62 }
 0x2a6   : > { %4622 = vmatmul.mubr.msk.bf16.gmra.mrb[40].mxu0 %vm1418_vm8, %v5986_v46 }
 0x2e5   : > { %v2085_v5 = vpop.f32.mrb[40].mxu1 }
 0x2e6   : > { %v4371_v56 = vpop.f32.mrb[41].mxu1 }
 0x2e7   : > { %v2088_v21 = vpop.f32.mrb[42].mxu1 }
 0x2e8   : > { %v4372_v0 = vpop.f32.mrb[43].mxu1 }
 0x2ed   : > { %v2093_v32 = vpop.f32.mrb[44].mxu1 }
 0x2ee   : > { %v4375_v47 = vpop.f32.mrb[45].mxu1 }
 0x2ef   : > { %v2096_v28 = vpop.f32.mrb[46].mxu1 }
 0x2f0   : > { %v4376_v6 = vpop.f32.mrb[47].mxu1 }
 0x2f5   : > { %v2101_v55 = vpop.f32.mrb[48].mxu1 }
 0x2f6   : > { %v4379_v33 = vpop.f32.mrb[49].mxu1 }
 0x2f7   : > { %v6322_v36 = vpop.f32.mrb[50].mxu1 }
 0x2f8   : > { %v4380_v1 = vpop.f32.mrb[51].mxu1 }
 0x2fd   : > { %v6324_v63 = vpop.f32.mrb[52].mxu1 }
 0x2fe   : > { %v4383_v3 = vpop.f32.mrb[53].mxu1 }
 0x2ff   : > { %v6326_v62 = vpop.f32.mrb[54].mxu1 }
 0x300   : > { %v4384_v48 = vpop.f32.mrb[55].mxu1 }
 0x301   : > { %v3457_v48 = vpop.permute.xlu0 %3456 }
 0x305   : > { %v6328_v46 = vpop.f32.mrb[56].mxu1 }
 0x306   : > { %v4387_v7 = vpop.f32.mrb[57].mxu1 }
 0x307   : > { %v6330_v50 = vpop.f32.mrb[58].mxu1 }
 0x308   : > { %v4388_v12 = vpop.f32.mrb[59].mxu1 }
 0x30d   : > { %v6332_v9 = vpop.f32.mrb[60].mxu1 }
 0x30e   : > { %v4391_v59 = vpop.f32.mrb[61].mxu1 }
 0x30f   : > { %v6334_v61 = vpop.f32.mrb[62].mxu1 }
 0x310   : > { %v4392_v40 = vpop.f32.mrb[63].mxu1 }
 0x315   : > { %v6336_v58 = vpop.f32.mrb[64].mxu1 }
 0x316   : > { %v4395_v38 = vpop.f32.mrb[65].mxu1 }
 0x317   : > { %v6338_v45 = vpop.f32.mrb[66].mxu1 }
 0x318   : > { %v4396_v54 = vpop.f32.mrb[67].mxu1 }
 0x31d   : > { %v6340_v23 = vpop.f32.mrb[68].mxu1 }
 0x31e   : > { %v4399_v17 = vpop.f32.mrb[69].mxu1 }
 0x31f   : > { %v6342_v8 = vpop.f32.mrb[70].mxu1 }
 0x320   : > { %v4400_v43 = vpop.f32.mrb[71].mxu1 }
 0x325   : > { %v6344_v16 = vpop.f32.mrb[72].mxu1 }
 0x326   : > { %v4403_v20 = vpop.f32.mrb[73].mxu1 }
 0x327   : > { %v6346_v22 = vpop.f32.mrb[74].mxu1 }
 0x328   : > { %v4404_v24 = vpop.f32.mrb[75].mxu1 }
 0x339   : > { %v3322_v49 = vpop.f32.mrb[8].mxu0 }
 0x33a   : > { %v4629_v29 = vadd.f32 %v3322_v49, %v2085_v5  ;;  %v4591_v39 = vpop.f32.mrb[9].mxu0 }
 0x33b   : > { %v3325_v2 = vpop.f32.mrb[10].mxu0 }
 0x33c   : > { %v3519_v42 = vmul.f32 %v4629_v29, %v3432_v26  ;;  %v4630_v60 = vadd.f32 %v3325_v2, %v2088_v21  ;;  %v4592_v52 = vpop.f32.mrb[11].mxu0  ;;  %v3467_v26 = vpop.permute.xlu0 %3466 }
 0x33e   : > { %v3538_v34 = vmul.f32 %v3519_v42, %v3519_v42  ;;  %v3520_v10 = vmul.f32 %v4630_v60, %v3437_v41 }
 0x340   : > { %v3539_v4 = vmul.f32 %v3520_v10, %v3520_v10  ;;  %v3556_v15 = vsel %vm1418_vm8, %v3538_v34, 0.0 }
 0x341   : > { %v3330_v14 = vpop.f32.mrb[12].mxu0 }
 0x342   : > { %v3557_v35 = vsel %vm1418_vm8, %v3539_v4, 0.0  ;;  %v4631_v25 = vadd.f32 %v3330_v14, %v2093_v32  ;;  %v4595_v11 = vpop.f32.mrb[13].mxu0  ;;  %v3452_v32 = vpop.permute.xlu1 %3451 }
 0x343   : > { %v3558_v57 = vadd.f32 %v3557_v35, %v3556_v15  ;;  %v3333_v44 = vpop.f32.mrb[14].mxu0 }
 0x344   : > { %v3521_v53 = vmul.f32 %v4631_v25, %v3442_v31  ;;  %v4632_v19 = vadd.f32 %v3333_v44, %v2096_v28  ;;  %v4596_v30 = vpop.f32.mrb[15].mxu0  ;;  %v3477_v31 = vpop.permute.xlu0 %3476 }
 0x346   : > { %v3540_v37 = vmul.f32 %v3521_v53, %v3521_v53  ;;  %v3522_v51 = vmul.f32 %v4632_v19, %v3447_v18  ;;  %v3462_v20 = vpop.permute.xlu1 %3461 }
 0x348   : > { %v3559_v13 = vsel %vm1418_vm8, %v3540_v37, 0.0  ;;  %v3541_v27 = vmul.f32 %v3522_v51, %v3522_v51 }
 0x349   : > { %v3560_v5 = vadd.f32 %v3559_v13, %v3558_v57  ;;  %v3338_v56 = vpop.f32.mrb[16].mxu0 }
 0x34a   : > { %v3561_v21 = vsel %vm1418_vm8, %v3541_v27, 0.0  ;;  %v4633_v0 = vadd.f32 %v3338_v56, %v2101_v55  ;;  %v4599_v47 = vpop.f32.mrb[17].mxu0  ;;  %v3472_v14 = vpop.permute.xlu1 %3471 }
 0x34b   : > { %v3562_v6 = vadd.f32 %v3561_v21, %v3560_v5  ;;  %v3341_v33 = vpop.f32.mrb[18].mxu0 }
 0x34c   : > { %v3523_v1 = vmul.f32 %v4633_v0, %v3452_v32  ;;  %v4634_v3 = vadd.f32 %v3341_v33, %v6322_v36  ;;  %v4600_v28 = vpop.f32.mrb[19].mxu0  ;;  %v3487_v0 = vpop.permute.xlu0 %3486 }
 0x34e   : > { %v3542_v7 = vmul.f32 %v3523_v1, %v3523_v1  ;;  %v3524_v12 = vmul.f32 %v4634_v3, %v3457_v48  ;;  %v3482_v13 = vpop.permute.xlu1 %3481 }
 0x350   : > { %v3563_v59 = vsel %vm1418_vm8, %v3542_v7, 0.0  ;;  %v3543_v40 = vmul.f32 %v3524_v12, %v3524_v12 }
 0x351   : > { %v3564_v38 = vadd.f32 %v3563_v59, %v3562_v6  ;;  %v3346_v54 = vpop.f32.mrb[20].mxu0 }
 0x352   : > { %v3565_v17 = vsel %vm1418_vm8, %v3543_v40, 0.0  ;;  %v4635_v55 = vadd.f32 %v3346_v54, %v6324_v63  ;;  %v4603_v43 = vpop.f32.mrb[21].mxu0  ;;  %v3492_v7 = vpop.permute.xlu1 %3491 }
 0x353   : > { %v3566_v24 = vadd.f32 %v3565_v17, %v3564_v38  ;;  %v3349_v49 = vpop.f32.mrb[22].mxu0  ;;  %v3497_v54 = vpop.permute.xlu0 %3496 }
 0x354   : > { %v3525_v29 = vmul.f32 %v4635_v55, %v3462_v20  ;;  %v4636_v36 = vadd.f32 %v3349_v49, %v6326_v62  ;;  %v4604_v39 = vpop.f32.mrb[23].mxu0 }
 0x356   : > { %v3544_v2 = vmul.f32 %v3525_v29, %v3525_v29  ;;  %v3526_v42 = vmul.f32 %v4636_v36, %v3467_v26  ;;  %v3502_v39 = vpop.permute.xlu1 %3501 }
 0x358   : > { %v3567_v60 = vsel %vm1418_vm8, %v3544_v2, 0.0  ;;  %v3545_v52 = vmul.f32 %v3526_v42, %v3526_v42 }
 0x359   : > { %v3568_v41 = vadd.f32 %v3567_v60, %v3566_v24  ;;  %v3354_v34 = vpop.f32.mrb[24].mxu0 }
 0x35a   : > { %v3569_v10 = vsel %vm1418_vm8, %v3545_v52, 0.0  ;;  %v4637_v63 = vadd.f32 %v3354_v34, %v6328_v46  ;;  %v4607_v4 = vpop.f32.mrb[25].mxu0  ;;  %v3507_v52 = vpop.permute.xlu0 %3506 }
 0x35b   : > { %v3570_v15 = vadd.f32 %v3569_v10, %v3568_v41  ;;  %v3357_v35 = vpop.f32.mrb[26].mxu0 }
 0x35c   : > { %v3527_v25 = vmul.f32 %v4637_v63, %v3472_v14  ;;  %v4638_v62 = vadd.f32 %v3357_v35, %v6330_v50  ;;  %v4608_v11 = vpop.f32.mrb[27].mxu0 }
 0x35e   : > { %v3546_v57 = vmul.f32 %v3527_v25, %v3527_v25  ;;  %v3528_v44 = vmul.f32 %v4638_v62, %v3477_v31  ;;  %v3512_v25 = vpop.permute.xlu1 %3511 }
 0x360   : > { %v3571_v53 = vsel %vm1418_vm8, %v3546_v57, 0.0  ;;  %v3547_v19 = vmul.f32 %v3528_v44, %v3528_v44  ;;  %v3517_v44 = vpop.permute.xlu0 %3516 }
 0x361   : > { %v3572_v30 = vadd.f32 %v3571_v53, %v3570_v15  ;;  %v3362_v18 = vpop.f32.mrb[28].mxu0 }
 0x362   : > { %v3573_v37 = vsel %vm1418_vm8, %v3547_v19, 0.0  ;;  %v4639_v46 = vadd.f32 %v3362_v18, %v6332_v9  ;;  %v4611_v51 = vpop.f32.mrb[29].mxu0 }
 0x363   : > { %v3574_v27 = vadd.f32 %v3573_v37, %v3572_v30  ;;  %v3365_v5 = vpop.f32.mrb[30].mxu0 }
 0x364   : > { %v3529_v56 = vmul.f32 %v4639_v46, %v3482_v13  ;;  %v4640_v50 = vadd.f32 %v3365_v5, %v6334_v61  ;;  %v4612_v21 = vpop.f32.mrb[31].mxu0 }
 0x365   : > { %v3537_v21 = vld [vmem:[%s5170_s12] sm:$0x1] }
 0x366   : > { %v3548_v47 = vmul.f32 %v3529_v56, %v3529_v56  ;;  %v3530_v32 = vmul.f32 %v4640_v50, %v3487_v0 }
 0x368   : > { %v3575_v6 = vsel %vm1418_vm8, %v3548_v47, 0.0  ;;  %v3549_v33 = vmul.f32 %v3530_v32, %v3530_v32 }
 0x369   : > { %v3576_v1 = vadd.f32 %v3575_v6, %v3574_v27  ;;  %v3370_v3 = vpop.f32.mrb[32].mxu0 }
 0x36a   : > { %v3577_v28 = vsel %vm1418_vm8, %v3549_v33, 0.0  ;;  %v4641_v9 = vadd.f32 %v3370_v3, %v6336_v58  ;;  %v4615_v48 = vpop.f32.mrb[33].mxu0 }
 0x36b   : > { %v3578_v12 = vadd.f32 %v3577_v28, %v3576_v1  ;;  %v3373_v59 = vpop.f32.mrb[34].mxu0 }
 0x36c   : > { %v3531_v40 = vmul.f32 %v4641_v9, %v3492_v7  ;;  %v4642_v61 = vadd.f32 %v3373_v59, %v6338_v45  ;;  %v4616_v38 = vpop.f32.mrb[35].mxu0 }
 0x36e   : > { %v3550_v17 = vmul.f32 %v3531_v40, %v3531_v40  ;;  %v3532_v55 = vmul.f32 %v4642_v61, %v3497_v54 }
 0x370   : > { %v3579_v43 = vsel %vm1418_vm8, %v3550_v17, 0.0  ;;  %v3551_v20 = vmul.f32 %v3532_v55, %v3532_v55 }
 0x371   : > { %v3580_v24 = vadd.f32 %v3579_v43, %v3578_v12  ;;  %v3378_v49 = vpop.f32.mrb[36].mxu0 }
 0x372   : > { %v3581_v29 = vsel %vm1418_vm8, %v3551_v20, 0.0  ;;  %v4643_v58 = vadd.f32 %v3378_v49, %v6340_v23  ;;  %v4619_v36 = vpop.f32.mrb[37].mxu0 }
 0x373   : > { %v3582_v26 = vadd.f32 %v3581_v29, %v3580_v24  ;;  %v3381_v2 = vpop.f32.mrb[38].mxu0 }
 0x374   : > { %v3533_v42 = vmul.f32 %v4643_v58, %v3502_v39  ;;  %v4644_v45 = vadd.f32 %v3381_v2, %v6342_v8  ;;  %v4620_v60 = vpop.f32.mrb[39].mxu0 }
 0x376   : > { %v3552_v41 = vmul.f32 %v3533_v42, %v3533_v42  ;;  %v3534_v34 = vmul.f32 %v4644_v45, %v3507_v52 }
 0x378   : > { %v3583_v10 = vsel %vm1418_vm8, %v3552_v41, 0.0  ;;  %v3553_v63 = vmul.f32 %v3534_v34, %v3534_v34 }
 0x379   : > { %v3584_v4 = vadd.f32 %v3583_v10, %v3582_v26  ;;  %v3386_v14 = vpop.f32.mrb[40].mxu0 }
 0x37a   : > { %v3585_v15 = vsel %vm1418_vm8, %v3553_v63, 0.0  ;;  %v4645_v23 = vadd.f32 %v3386_v14, %v6344_v16  ;;  %v4623_v35 = vpop.f32.mrb[41].mxu0 }
 0x37b   : > { %v3389_v62 = vpop.f32.mrb[42].mxu0  ;;  %v3586_v11 = vadd.f32 %v3585_v15, %v3584_v4 }
 0x37c   : > { %v3535_v31 = vmul.f32 %v4645_v23, %v3512_v25  ;;  %v4646_v8 = vadd.f32 %v3389_v62, %v6346_v22  ;;  %v4624_v57 = vpop.f32.mrb[43].mxu0 }
 0x37e   : > { %v3554_v53 = vmul.f32 %v3535_v31, %v3535_v31  ;;  %v3536_v19 = vmul.f32 %v4646_v8, %v3517_v44 }
 0x380   : > { %v3555_v30 = vmul.f32 %v3536_v19, %v3536_v19  ;;  %v3587_v18 = vsel %vm1418_vm8, %v3554_v53, 0.0 }
 0x381   : > { %v3588_v37 = vadd.f32 %v3587_v18, %v3586_v11 }
 0x382   : > { %v3589_v46 = vsel %vm1418_vm8, %v3555_v30, 0.0 }
 0x383   : > { %v3590_v16 = vadd.f32 %v3589_v46, %v3588_v37 }
 0x385   : > { %3591 = vadd.xlane.f32.xlu1 %v3590_v16 }
 0x412   : > { %v3592_v51 = vpop.xlane.xlu1 %3591 }
 0x413   : > { %v3593_v13 = vrot.slane %v3592_v51, 4 }
 0x415   : > { %v3594_v27 = vadd.f32 %v3593_v13, %v3592_v51 }
 0x417   : > { %v3595_v5 = vrot.slane %v3594_v27, 2 }
 0x419   : > { %v3596_v56 = vadd.f32 %v3595_v5, %v3594_v27 }
 0x41b   : > { %v3597_v22 = vrot.slane %v3596_v56, 1 }
 0x41d   : > { %v3598_v50 = vadd.f32 %v3597_v22, %v3596_v56 }
 0x41f   : > { %4902 = vpush %v3598_v50 }
 0x450   : > { %s4903_s14 = spop %4902 }
 0x451   : > { %v3600_v0 = vstv %s4903_s14 }
 0x452   : > { %v3601_v47 = vadd.f32 %v3600_v0, %v3537_v21 }
 0x454   : > { %3603 = vst.msk [vmem:[%s5170_s12] sm:$0x1] %vm3602_vm12, %v3601_v47 }
 0x455 PF: > { %s17_s28 = sadd.s32 1, %s5086_s28   ;;  %s6422_s15 = sld [smem:[#allocation3_spill]] }
 0x456   : > { %p14_p8 = scmp.ge.s32.totalorder %s17_s28, 6   ;;  %s6423_s24 = smov %s5078_s26 }
 0x457   : > { %s6424_s25 = smov %s5082_s27  ;;  %s6425_s26 = smov %s6428_s29 }
 0x458   :  { %16 = sbr.rel (!%p14_p8) target bundleno = 3 (0x3), region = 96 }
 0x45b   : > { %s6426_s27 = smov %s6422_s15 }

</bundles_post_ra>
